<compile_context>
chip_gen: v7x
topology: tpu7x:2x2x1
jax: 0.10.0
libtpu: 0.0.40
codegen_flags: <defaults>
</compile_context>

<pallas_src>
import functools

import numpy as np
import jax
import jax.numpy as jnp
from jax.experimental import pallas as pl
from jax.experimental.pallas import tpu as pltpu

_INV_SQRT2 = 0.7071067811865476


def _gelu(x):
    # exact (erf-based) GELU, matching torch.nn.GELU(approximate='none')
    return 0.5 * x * (1.0 + jax.lax.erf(x * _INV_SQRT2))


# ---------------------------------------------------------------------------
# Fused Pallas kernel: the whole SMRB block for one batch element.
# Activations are (channels, H*W) -- spatial flattened onto the lane axis.
# ---------------------------------------------------------------------------
def _smrb_fused_kernel(
    x_ref, cmask_ref, pmask_ref,
    pw1_ref, dw1w_ref, dw1b_ref, c2w_ref,
    pw3_ref, dw3w_ref, dw3b_ref, c5_ref,
    e1w_ref, e1b_ref, e2w_ref, e2b_ref,
    e3w_ref, e3b_ref, efw_ref, efb_ref,
    e4w_ref, e4b_ref,
    o_ref, *, H, W):
  HW = H * W

  def mm(w, v):                                   # (Cout,Cin) @ (Cin,HW) on the MXU
    return jnp.dot(w, v, preferred_element_type=jnp.float32)

  def shifted(v, dy, dx):
    # shifted[:, h*W + w] == v[:, (h+dy)*W + (w+dx)]  (wrap handled by masks)
    s = (-(dy * W + dx)) % HW
    return v if s == 0 else pltpu.roll(v, s, 1)   # lane rotation -> XLU slot

  # Hoisted once: the 9 border masks of the centred taps (shared by dw1, c2, dw3).
  ctaps = [(dy, dx) for dy in (-1, 0, 1) for dx in (-1, 0, 1)]
  vtaps = [(dy, dx) for dy in (0, 1, 2) for dx in (0, 1, 2)]
  masks = [cmask_ref[k] for k in range(9)]        # each (1, HW)

  def dwconv3x3(v, w_ref, b_ref):
    # depthwise 3x3, padding 1; w_ref (9, C, 1) tap-major, b_ref (C, 1)
    acc = None
    for k, (dy, dx) in enumerate(ctaps):
      t = shifted(v, dy, dx)
      if dy or dx:
        t = t * masks[k]
      t = t * w_ref[k]
      acc = t if acc is None else acc + t
    return acc + b_ref[...]

  def conv3x3(v, w_ref):
    # dense 3x3, padding 1, no bias; w_ref (9, Cout, Cin) tap-major
    acc = None
    for k, (dy, dx) in enumerate(ctaps):
      t = shifted(v, dy, dx)
      if dy or dx:
        t = t * masks[k]
      t = mm(w_ref[k], t)
      acc = t if acc is None else acc + t
    return acc

  x = x_ref[...]                                  # (C, HW)

  # ---- main residual branch ----------------------------------------------
  t = mm(pw1_ref[...], x)                         # c1_r.pw (1x1, no bias)
  t = _gelu(dwconv3x3(t, dw1w_ref, dw1b_ref))     # c1_r.dw (+GELU)
  t = _gelu(conv3x3(t, c2w_ref))                  # c2_r    (+GELU)
  t = mm(pw3_ref[...], t)                         # c3_r.pw
  t = _gelu(dwconv3x3(t, dw3w_ref, dw3b_ref))     # c3_r.dw (+GELU)
  t5 = mm(c5_ref[...], t + x)                     # residual add + c5 (1x1)

  # ---- ESA ------------------------------------------------------------------
  c1_ = mm(e1w_ref[...], t5) + e1b_ref[...]       # conv1 (1x1), (f, HW)

  # conv2 (3x3, stride 2, valid) fused with max_pool2d(7, 3): the pooled map is
  # 1x1 here, so it is a masked global max over the lanes that correspond to
  # stride-2 conv outputs inside the single 7x7 pooling window.
  acc = None
  for k, (dy, dx) in enumerate(vtaps):
    t2 = mm(e2w_ref[k], shifted(c1_, dy, dx))
    acc = t2 if acc is None else acc + t2
  neg = jnp.full_like(acc, -jnp.inf)
  vmax = jnp.max(jnp.where(pmask_ref[...] > 0.5, acc, neg),
                 axis=1, keepdims=True) + e2b_ref[...]       # (f, 1)

  # conv3 (3x3, pad 1) on the 1x1 pooled map only sees its centre tap, and the
  # bilinear upsample of a 1x1 map is a broadcast -> one lane-broadcast matmul.
  c3u = mm(e3w_ref[...], jnp.broadcast_to(vmax, c1_.shape)) + e3b_ref[...]
  cf = mm(efw_ref[...], c1_) + efb_ref[...]       # conv_f (1x1)
  c4 = mm(e4w_ref[...], c3u + cf) + e4b_ref[...]  # conv4 (1x1), (C, HW)
  o_ref[...] = t5 * jax.nn.sigmoid(c4)            # x * sigmoid(mask)


def _whole_spec(a):
    zeros = (0,) * a.ndim
    return pl.BlockSpec(tuple(a.shape), lambda n, _z=zeros: _z)


def smrb_forward(x_nchw, params):
    """SMRB forward. x_nchw: (N, C, H, W) f32; params in PyTorch (OIHW) layouts."""
    x_nchw = x_nchw.astype(jnp.float32)
    N, C, H, W = x_nchw.shape
    HW = H * W

    # The fused ESA tail assumes the post-maxpool map is 1x1 (holds for the
    # small feature maps this block is meant for, 15 <= H, W <= 20) and a
    # lane-dense flattened spatial axis.
    H2, W2 = (H - 3) // 2 + 1, (W - 3) // 2 + 1
    pooled_1x1 = (H2 >= 7 and W2 >= 7
                  and (H2 - 7) // 3 + 1 == 1 and (W2 - 7) // 3 + 1 == 1)
    if not pooled_1x1 or HW % 128 != 0:
        # TODO(synk): general ESA tail (pooled map > 1x1 -> true bilinear resize
        # + windowed max-pool) is not implemented in the fused kernel.
        raise NotImplementedError(
            "fused SMRB kernel requires a 1x1 pooled ESA map and H*W % 128 == 0")

    # --- constants: border masks for the 9 centred taps + pool-position mask
    hh, ww = np.meshgrid(np.arange(H), np.arange(W), indexing="ij")
    cmask = np.stack(
        [(((hh + dy) >= 0) & ((hh + dy) < H) & ((ww + dx) >= 0) & ((ww + dx) < W))
         .reshape(1, HW).astype(np.float32)
         for dy in (-1, 0, 1) for dx in (-1, 0, 1)], axis=0)          # (9, 1, HW)
    pmask = np.zeros((H, W), np.float32)
    pmask[0:13:2, 0:13:2] = 1.0   # stride-2 conv outputs covered by the 7x7 pool window
    pmask = pmask.reshape(1, HW)

    # --- weight re-layout: PyTorch OIHW -> kernel layouts --------------------
    def pw(w):      # 1x1 conv (Cout, Cin, 1, 1) -> (Cout, Cin)
        return w[:, :, 0, 0]

    def taps(w):    # 3x3 conv (Cout, Cin, 3, 3) -> (9, Cout, Cin), k = ky*3 + kx
        return jnp.transpose(w, (2, 3, 0, 1)).reshape(9, w.shape[0], w.shape[1])

    def col(b):     # bias (C,) -> (C, 1), broadcast along lanes in-kernel
        return b.reshape(-1, 1)

    operands = [
        x_nchw.reshape(N, C, HW),
        jnp.asarray(cmask), jnp.asarray(pmask),
        pw(params["pw1_w"]), taps(params["dw1_w"]), col(params["dw1_b"]),
        taps(params["c2_w"]),
        pw(params["pw3_w"]), taps(params["dw3_w"]), col(params["dw3_b"]),
        pw(params["c5_w"]),
        pw(params["e1_w"]), col(params["e1_b"]),
        taps(params["e2_w"]), col(params["e2_b"]),
        params["e3_w"][:, :, 1, 1], col(params["e3_b"]),   # conv3 centre tap only
        pw(params["ef_w"]), col(params["ef_b"]),
        pw(params["e4_w"]), col(params["e4_b"]),
    ]

    batch_spec = pl.BlockSpec((None, C, HW), lambda n: (n, 0, 0))
    in_specs = [batch_spec] + [_whole_spec(a) for a in operands[1:]]

    out = pl.pallas_call(
        functools.partial(_smrb_fused_kernel, H=H, W=W),
        out_shape=jax.ShapeDtypeStruct((N, C, HW), jnp.float32),
        grid=(N,),
        in_specs=in_specs,
        out_specs=pl.BlockSpec((None, C, HW), lambda n: (n, 0, 0)),
        compiler_params=pltpu.CompilerParams(
            dimension_semantics=("parallel",)),   # shard batches across TCs (v7x)
    )(*operands)
    return out.reshape(N, C, H, W)


# ---------------------------------------------------------------------------
# Plain-JAX/XLA reference of the PyTorch module (used only to check the kernel)
# ---------------------------------------------------------------------------
def smrb_reference(x, p):
    hi = jax.lax.Precision.HIGHEST

    def conv(v, w, b=None, stride=1, padding=0, groups=1):
        out = jax.lax.conv_general_dilated(
            v, w, (stride, stride), [(padding, padding)] * 2,
            dimension_numbers=("NCHW", "OIHW", "NCHW"),
            feature_group_count=groups, precision=hi)
        if b is not None:
            out = out + b.reshape(1, -1, 1, 1)
        return out

    gelu = lambda z: jax.nn.gelu(z, approximate=False)
    N, C, H, W = x.shape
    f = p["e1_w"].shape[0]

    t = conv(x, p["pw1_w"])
    t = gelu(conv(t, p["dw1_w"], p["dw1_b"], padding=1, groups=C))
    t = gelu(conv(t, p["c2_w"], padding=1))
    t = conv(t, p["pw3_w"])
    t = gelu(conv(t, p["dw3_w"], p["dw3_b"], padding=1, groups=C))
    t5 = conv(t + x, p["c5_w"])

    c1_ = conv(t5, p["e1_w"], p["e1_b"])
    c1 = conv(c1_, p["e2_w"], p["e2_b"], stride=2, padding=0)
    vmax = jax.lax.reduce_window(c1, -jnp.inf, jax.lax.max,
                                 (1, 1, 7, 7), (1, 1, 3, 3), "VALID")
    c3 = conv(vmax, p["e3_w"], p["e3_b"], padding=1)
    c3u = jnp.broadcast_to(c3, (N, f, H, W))   # bilinear upsample of a 1x1 map
    cf = conv(c1_, p["ef_w"], p["ef_b"])
    c4 = conv(c3u + cf, p["e4_w"], p["e4_b"])
    return t5 * jax.nn.sigmoid(c4)


def init_params(key, C, f=16):
    """Deterministic parameters in PyTorch layouts (OIHW, depthwise (C,1,3,3))."""
    ks = iter(jax.random.split(key, 24))

    def w(shape):
        fan_in = int(np.prod(shape[1:])) if len(shape) > 1 else int(shape[0])
        return jax.random.normal(next(ks), shape, jnp.float32) / np.sqrt(fan_in)

    p = {}
    p["pw1_w"] = w((C, C, 1, 1))
    p["dw1_w"] = w((C, 1, 3, 3)); p["dw1_b"] = w((C,))
    p["c2_w"] = w((C, C, 3, 3))
    p["pw3_w"] = w((C, C, 1, 1))
    p["dw3_w"] = w((C, 1, 3, 3)); p["dw3_b"] = w((C,))
    p["c5_w"] = w((C, C, 1, 1))
    p["e1_w"] = w((f, C, 1, 1)); p["e1_b"] = w((f,))
    p["e2_w"] = w((f, f, 3, 3)); p["e2_b"] = w((f,))
    p["e3_w"] = w((f, f, 3, 3)); p["e3_b"] = w((f,))
    p["ef_w"] = w((f, f, 1, 1)); p["ef_b"] = w((f,))
    p["e4_w"] = w((C, f, 1, 1)); p["e4_b"] = w((C,))
    return p


if __name__ == "__main__":
    key = jax.random.PRNGKey(0)
    kx, kp = jax.random.split(key)

    N, C, H, W = 2, 8, 16, 16      # 15 <= H, W <= 20 so the ESA pooled map is 1x1
    x = jax.random.normal(kx, (N, C, H, W), jnp.float32)
    params = init_params(kp, C, f=16)

    y = jax.jit(smrb_forward)(x, params)
    jax.block_until_ready(y)
    assert y.shape == (N, C, H, W) and y.dtype == jnp.float32
    assert bool(jnp.all(jnp.isfinite(y)))

    # correctness check against a plain-XLA reference of the PyTorch module
    y_ref = jax.jit(smrb_reference)(x, params)
    err = float(jnp.max(jnp.abs(y - y_ref)))
    assert err < 5e-2, f"kernel/reference mismatch: max abs err = {err}"

    print("KERNEL_OK")
</pallas_src>

<mosaic_0001>
module attributes {stable_mosaic.version = 11 : i64} {
  func.func @_smrb_fused_kernel(%arg0: i32, %arg1: memref<1x8x256xf32, #tpu.memory_space<vmem>>, %arg2: memref<9x1x256xf32, #tpu.memory_space<vmem>>, %arg3: memref<1x256xf32, #tpu.memory_space<vmem>>, %arg4: memref<8x8xf32, #tpu.memory_space<vmem>>, %arg5: memref<9x8x1xf32, #tpu.memory_space<vmem>>, %arg6: memref<8x1xf32, #tpu.memory_space<vmem>>, %arg7: memref<9x8x8xf32, #tpu.memory_space<vmem>>, %arg8: memref<8x8xf32, #tpu.memory_space<vmem>>, %arg9: memref<9x8x1xf32, #tpu.memory_space<vmem>>, %arg10: memref<8x1xf32, #tpu.memory_space<vmem>>, %arg11: memref<8x8xf32, #tpu.memory_space<vmem>>, %arg12: memref<16x8xf32, #tpu.memory_space<vmem>>, %arg13: memref<16x1xf32, #tpu.memory_space<vmem>>, %arg14: memref<9x16x16xf32, #tpu.memory_space<vmem>>, %arg15: memref<16x1xf32, #tpu.memory_space<vmem>>, %arg16: memref<16x16xf32, #tpu.memory_space<vmem>>, %arg17: memref<16x1xf32, #tpu.memory_space<vmem>>, %arg18: memref<16x16xf32, #tpu.memory_space<vmem>>, %arg19: memref<16x1xf32, #tpu.memory_space<vmem>>, %arg20: memref<8x16xf32, #tpu.memory_space<vmem>>, %arg21: memref<8x1xf32, #tpu.memory_space<vmem>>, %arg22: memref<1x8x256xf32, #tpu.memory_space<vmem>>) attributes {dimension_semantics = [#tpu.dimension_semantics<parallel>], iteration_bounds = array<i64: 2>, scalar_prefetch = 0 : i64, scratch_operands = 0 : i64, tpu.core_type = #tpu.core_type<tc>, window_params = [{transform_indices = @transform_0, window_bounds = array<i64: 1, 8, 256>}, {pipeline_mode = #tpu.pipeline_mode<synchronous>, transform_indices = @transform_1, window_bounds = array<i64: 9, 1, 256>}, {pipeline_mode = #tpu.pipeline_mode<synchronous>, transform_indices = @transform_2, window_bounds = array<i64: 1, 256>}, {pipeline_mode = #tpu.pipeline_mode<synchronous>, transform_indices = @transform_3, window_bounds = array<i64: 8, 8>}, {pipeline_mode = #tpu.pipeline_mode<synchronous>, transform_indices = @transform_4, window_bounds = array<i64: 9, 8, 1>}, {pipeline_mode = #tpu.pipeline_mode<synchronous>, transform_indices = @transform_5, window_bounds = array<i64: 8, 1>}, {pipeline_mode = #tpu.pipeline_mode<synchronous>, transform_indices = @transform_6, window_bounds = array<i64: 9, 8, 8>}, {pipeline_mode = #tpu.pipeline_mode<synchronous>, transform_indices = @transform_7, window_bounds = array<i64: 8, 8>}, {pipeline_mode = #tpu.pipeline_mode<synchronous>, transform_indices = @transform_8, window_bounds = array<i64: 9, 8, 1>}, {pipeline_mode = #tpu.pipeline_mode<synchronous>, transform_indices = @transform_9, window_bounds = array<i64: 8, 1>}, {pipeline_mode = #tpu.pipeline_mode<synchronous>, transform_indices = @transform_10, window_bounds = array<i64: 8, 8>}, {pipeline_mode = #tpu.pipeline_mode<synchronous>, transform_indices = @transform_11, window_bounds = array<i64: 16, 8>}, {pipeline_mode = #tpu.pipeline_mode<synchronous>, transform_indices = @transform_12, window_bounds = array<i64: 16, 1>}, {pipeline_mode = #tpu.pipeline_mode<synchronous>, transform_indices = @transform_13, window_bounds = array<i64: 9, 16, 16>}, {pipeline_mode = #tpu.pipeline_mode<synchronous>, transform_indices = @transform_14, window_bounds = array<i64: 16, 1>}, {pipeline_mode = #tpu.pipeline_mode<synchronous>, transform_indices = @transform_15, window_bounds = array<i64: 16, 16>}, {pipeline_mode = #tpu.pipeline_mode<synchronous>, transform_indices = @transform_16, window_bounds = array<i64: 16, 1>}, {pipeline_mode = #tpu.pipeline_mode<synchronous>, transform_indices = @transform_17, window_bounds = array<i64: 16, 16>}, {pipeline_mode = #tpu.pipeline_mode<synchronous>, transform_indices = @transform_18, window_bounds = array<i64: 16, 1>}, {pipeline_mode = #tpu.pipeline_mode<synchronous>, transform_indices = @transform_19, window_bounds = array<i64: 8, 16>}, {pipeline_mode = #tpu.pipeline_mode<synchronous>, transform_indices = @transform_20, window_bounds = array<i64: 8, 1>}, {transform_indices = @transform_21, window_bounds = array<i64: 1, 8, 256>}]} {
    %c0 = arith.constant 0 : index
    %c0_0 = arith.constant 0 : index
    %c0_1 = arith.constant 0 : index
    %0 = vector.load %arg2[%c0, %c0_0, %c0_1] : memref<9x1x256xf32, #tpu.memory_space<vmem>>, vector<1x1x256xf32>
    %1 = vector.shape_cast %0 : vector<1x1x256xf32> to vector<1x256xf32>
    %c1 = arith.constant 1 : index
    %c0_2 = arith.constant 0 : index
    %c0_3 = arith.constant 0 : index
    %2 = vector.load %arg2[%c1, %c0_2, %c0_3] : memref<9x1x256xf32, #tpu.memory_space<vmem>>, vector<1x1x256xf32>
    %3 = vector.shape_cast %2 : vector<1x1x256xf32> to vector<1x256xf32>
    %c2 = arith.constant 2 : index
    %c0_4 = arith.constant 0 : index
    %c0_5 = arith.constant 0 : index
    %4 = vector.load %arg2[%c2, %c0_4, %c0_5] : memref<9x1x256xf32, #tpu.memory_space<vmem>>, vector<1x1x256xf32>
    %5 = vector.shape_cast %4 : vector<1x1x256xf32> to vector<1x256xf32>
    %c3 = arith.constant 3 : index
    %c0_6 = arith.constant 0 : index
    %c0_7 = arith.constant 0 : index
    %6 = vector.load %arg2[%c3, %c0_6, %c0_7] : memref<9x1x256xf32, #tpu.memory_space<vmem>>, vector<1x1x256xf32>
    %7 = vector.shape_cast %6 : vector<1x1x256xf32> to vector<1x256xf32>
    %c5 = arith.constant 5 : index
    %c0_8 = arith.constant 0 : index
    %c0_9 = arith.constant 0 : index
    %8 = vector.load %arg2[%c5, %c0_8, %c0_9] : memref<9x1x256xf32, #tpu.memory_space<vmem>>, vector<1x1x256xf32>
    %9 = vector.shape_cast %8 : vector<1x1x256xf32> to vector<1x256xf32>
    %c6 = arith.constant 6 : index
    %c0_10 = arith.constant 0 : index
    %c0_11 = arith.constant 0 : index
    %10 = vector.load %arg2[%c6, %c0_10, %c0_11] : memref<9x1x256xf32, #tpu.memory_space<vmem>>, vector<1x1x256xf32>
    %11 = vector.shape_cast %10 : vector<1x1x256xf32> to vector<1x256xf32>
    %c7 = arith.constant 7 : index
    %c0_12 = arith.constant 0 : index
    %c0_13 = arith.constant 0 : index
    %12 = vector.load %arg2[%c7, %c0_12, %c0_13] : memref<9x1x256xf32, #tpu.memory_space<vmem>>, vector<1x1x256xf32>
    %13 = vector.shape_cast %12 : vector<1x1x256xf32> to vector<1x256xf32>
    %c8 = arith.constant 8 : index
    %c0_14 = arith.constant 0 : index
    %c0_15 = arith.constant 0 : index
    %14 = vector.load %arg2[%c8, %c0_14, %c0_15] : memref<9x1x256xf32, #tpu.memory_space<vmem>>, vector<1x1x256xf32>
    %15 = vector.shape_cast %14 : vector<1x1x256xf32> to vector<1x256xf32>
    %c0_16 = arith.constant 0 : index
    %c0_17 = arith.constant 0 : index
    %c0_18 = arith.constant 0 : index
    %16 = vector.load %arg1[%c0_16, %c0_17, %c0_18] : memref<1x8x256xf32, #tpu.memory_space<vmem>>, vector<1x8x256xf32>
    %17 = vector.shape_cast %16 : vector<1x8x256xf32> to vector<8x256xf32>
    %c0_19 = arith.constant 0 : index
    %c0_20 = arith.constant 0 : index
    %18 = vector.load %arg4[%c0_19, %c0_20] : memref<8x8xf32, #tpu.memory_space<vmem>>, vector<8x8xf32>
    %cst = arith.constant dense<0.000000e+00> : vector<8x256xf32>
    %19 = tpu.matmul %18, %17, %cst {dimension_numbers = #tpu.dot_dimension_numbers<[1], [0], [0], [1], [0, 0, 1, 1], [], []>} : vector<8x8xf32>, vector<8x256xf32>, vector<8x256xf32> -> vector<8x256xf32>
    %c17_i32 = arith.constant 17 : i32
    %20 = tpu.dynamic_rotate %19 by %c17_i32 dim 1 : vector<8x256xf32>, i32 -> vector<8x256xf32>
    %21 = vector.broadcast %1 : vector<1x256xf32> to vector<8x256xf32>
    %22 = arith.mulf %20, %21 : vector<8x256xf32>
    %c0_21 = arith.constant 0 : index
    %c0_22 = arith.constant 0 : index
    %c0_23 = arith.constant 0 : index
    %23 = vector.load %arg5[%c0_21, %c0_22, %c0_23] : memref<9x8x1xf32, #tpu.memory_space<vmem>>, vector<1x8x1xf32>
    %24 = vector.shape_cast %23 : vector<1x8x1xf32> to vector<8x1xf32>
    %25 = vector.broadcast %24 : vector<8x1xf32> to vector<8x256xf32>
    %26 = arith.mulf %22, %25 : vector<8x256xf32>
    %c16_i32 = arith.constant 16 : i32
    %27 = tpu.dynamic_rotate %19 by %c16_i32 dim 1 : vector<8x256xf32>, i32 -> vector<8x256xf32>
    %28 = vector.broadcast %3 : vector<1x256xf32> to vector<8x256xf32>
    %29 = arith.mulf %27, %28 : vector<8x256xf32>
    %c1_24 = arith.constant 1 : index
    %c0_25 = arith.constant 0 : index
    %c0_26 = arith.constant 0 : index
    %30 = vector.load %arg5[%c1_24, %c0_25, %c0_26] : memref<9x8x1xf32, #tpu.memory_space<vmem>>, vector<1x8x1xf32>
    %31 = vector.shape_cast %30 : vector<1x8x1xf32> to vector<8x1xf32>
    %32 = vector.broadcast %31 : vector<8x1xf32> to vector<8x256xf32>
    %33 = arith.mulf %29, %32 : vector<8x256xf32>
    %34 = arith.addf %26, %33 : vector<8x256xf32>
    %c15_i32 = arith.constant 15 : i32
    %35 = tpu.dynamic_rotate %19 by %c15_i32 dim 1 : vector<8x256xf32>, i32 -> vector<8x256xf32>
    %36 = vector.broadcast %5 : vector<1x256xf32> to vector<8x256xf32>
    %37 = arith.mulf %35, %36 : vector<8x256xf32>
    %c2_27 = arith.constant 2 : index
    %c0_28 = arith.constant 0 : index
    %c0_29 = arith.constant 0 : index
    %38 = vector.load %arg5[%c2_27, %c0_28, %c0_29] : memref<9x8x1xf32, #tpu.memory_space<vmem>>, vector<1x8x1xf32>
    %39 = vector.shape_cast %38 : vector<1x8x1xf32> to vector<8x1xf32>
    %40 = vector.broadcast %39 : vector<8x1xf32> to vector<8x256xf32>
    %41 = arith.mulf %37, %40 : vector<8x256xf32>
    %42 = arith.addf %34, %41 : vector<8x256xf32>
    %c1_i32 = arith.constant 1 : i32
    %43 = tpu.dynamic_rotate %19 by %c1_i32 dim 1 : vector<8x256xf32>, i32 -> vector<8x256xf32>
    %44 = vector.broadcast %7 : vector<1x256xf32> to vector<8x256xf32>
    %45 = arith.mulf %43, %44 : vector<8x256xf32>
    %c3_30 = arith.constant 3 : index
    %c0_31 = arith.constant 0 : index
    %c0_32 = arith.constant 0 : index
    %46 = vector.load %arg5[%c3_30, %c0_31, %c0_32] : memref<9x8x1xf32, #tpu.memory_space<vmem>>, vector<1x8x1xf32>
    %47 = vector.shape_cast %46 : vector<1x8x1xf32> to vector<8x1xf32>
    %48 = vector.broadcast %47 : vector<8x1xf32> to vector<8x256xf32>
    %49 = arith.mulf %45, %48 : vector<8x256xf32>
    %50 = arith.addf %42, %49 : vector<8x256xf32>
    %c4 = arith.constant 4 : index
    %c0_33 = arith.constant 0 : index
    %c0_34 = arith.constant 0 : index
    %51 = vector.load %arg5[%c4, %c0_33, %c0_34] : memref<9x8x1xf32, #tpu.memory_space<vmem>>, vector<1x8x1xf32>
    %52 = vector.shape_cast %51 : vector<1x8x1xf32> to vector<8x1xf32>
    %53 = vector.broadcast %52 : vector<8x1xf32> to vector<8x256xf32>
    %54 = arith.mulf %19, %53 : vector<8x256xf32>
    %55 = arith.addf %50, %54 : vector<8x256xf32>
    %c255_i32 = arith.constant 255 : i32
    %56 = tpu.dynamic_rotate %19 by %c255_i32 dim 1 : vector<8x256xf32>, i32 -> vector<8x256xf32>
    %57 = vector.broadcast %9 : vector<1x256xf32> to vector<8x256xf32>
    %58 = arith.mulf %56, %57 : vector<8x256xf32>
    %c5_35 = arith.constant 5 : index
    %c0_36 = arith.constant 0 : index
    %c0_37 = arith.constant 0 : index
    %59 = vector.load %arg5[%c5_35, %c0_36, %c0_37] : memref<9x8x1xf32, #tpu.memory_space<vmem>>, vector<1x8x1xf32>
    %60 = vector.shape_cast %59 : vector<1x8x1xf32> to vector<8x1xf32>
    %61 = vector.broadcast %60 : vector<8x1xf32> to vector<8x256xf32>
    %62 = arith.mulf %58, %61 : vector<8x256xf32>
    %63 = arith.addf %55, %62 : vector<8x256xf32>
    %c241_i32 = arith.constant 241 : i32
    %64 = tpu.dynamic_rotate %19 by %c241_i32 dim 1 : vector<8x256xf32>, i32 -> vector<8x256xf32>
    %65 = vector.broadcast %11 : vector<1x256xf32> to vector<8x256xf32>
    %66 = arith.mulf %64, %65 : vector<8x256xf32>
    %c6_38 = arith.constant 6 : index
    %c0_39 = arith.constant 0 : index
    %c0_40 = arith.constant 0 : index
    %67 = vector.load %arg5[%c6_38, %c0_39, %c0_40] : memref<9x8x1xf32, #tpu.memory_space<vmem>>, vector<1x8x1xf32>
    %68 = vector.shape_cast %67 : vector<1x8x1xf32> to vector<8x1xf32>
    %69 = vector.broadcast %68 : vector<8x1xf32> to vector<8x256xf32>
    %70 = arith.mulf %66, %69 : vector<8x256xf32>
    %71 = arith.addf %63, %70 : vector<8x256xf32>
    %c240_i32 = arith.constant 240 : i32
    %72 = tpu.dynamic_rotate %19 by %c240_i32 dim 1 : vector<8x256xf32>, i32 -> vector<8x256xf32>
    %73 = vector.broadcast %13 : vector<1x256xf32> to vector<8x256xf32>
    %74 = arith.mulf %72, %73 : vector<8x256xf32>
    %c7_41 = arith.constant 7 : index
    %c0_42 = arith.constant 0 : index
    %c0_43 = arith.constant 0 : index
    %75 = vector.load %arg5[%c7_41, %c0_42, %c0_43] : memref<9x8x1xf32, #tpu.memory_space<vmem>>, vector<1x8x1xf32>
    %76 = vector.shape_cast %75 : vector<1x8x1xf32> to vector<8x1xf32>
    %77 = vector.broadcast %76 : vector<8x1xf32> to vector<8x256xf32>
    %78 = arith.mulf %74, %77 : vector<8x256xf32>
    %79 = arith.addf %71, %78 : vector<8x256xf32>
    %c239_i32 = arith.constant 239 : i32
    %80 = tpu.dynamic_rotate %19 by %c239_i32 dim 1 : vector<8x256xf32>, i32 -> vector<8x256xf32>
    %81 = vector.broadcast %15 : vector<1x256xf32> to vector<8x256xf32>
    %82 = arith.mulf %80, %81 : vector<8x256xf32>
    %c8_44 = arith.constant 8 : index
    %c0_45 = arith.constant 0 : index
    %c0_46 = arith.constant 0 : index
    %83 = vector.load %arg5[%c8_44, %c0_45, %c0_46] : memref<9x8x1xf32, #tpu.memory_space<vmem>>, vector<1x8x1xf32>
    %84 = vector.shape_cast %83 : vector<1x8x1xf32> to vector<8x1xf32>
    %85 = vector.broadcast %84 : vector<8x1xf32> to vector<8x256xf32>
    %86 = arith.mulf %82, %85 : vector<8x256xf32>
    %87 = arith.addf %79, %86 : vector<8x256xf32>
    %c0_47 = arith.constant 0 : index
    %c0_48 = arith.constant 0 : index
    %88 = vector.load %arg6[%c0_47, %c0_48] : memref<8x1xf32, #tpu.memory_space<vmem>>, vector<8x1xf32>
    %89 = vector.broadcast %88 : vector<8x1xf32> to vector<8x256xf32>
    %90 = arith.addf %87, %89 : vector<8x256xf32>
    %cst_49 = arith.constant 5.000000e-01 : f32
    %91 = vector.broadcast %cst_49 : f32 to vector<8x256xf32>
    %92 = arith.mulf %91, %90 : vector<8x256xf32>
    %cst_50 = arith.constant 0.707106769 : f32
    %93 = vector.broadcast %cst_50 : f32 to vector<8x256xf32>
    %94 = arith.mulf %90, %93 : vector<8x256xf32>
    %95 = math.erf %94 : vector<8x256xf32>
    %cst_51 = arith.constant 1.000000e+00 : f32
    %96 = vector.broadcast %cst_51 : f32 to vector<8x256xf32>
    %97 = arith.addf %96, %95 : vector<8x256xf32>
    %98 = arith.mulf %92, %97 : vector<8x256xf32>
    %c17_i32_52 = arith.constant 17 : i32
    %99 = tpu.dynamic_rotate %98 by %c17_i32_52 dim 1 : vector<8x256xf32>, i32 -> vector<8x256xf32>
    %100 = vector.broadcast %1 : vector<1x256xf32> to vector<8x256xf32>
    %101 = arith.mulf %99, %100 : vector<8x256xf32>
    %c0_53 = arith.constant 0 : index
    %c0_54 = arith.constant 0 : index
    %c0_55 = arith.constant 0 : index
    %102 = vector.load %arg7[%c0_53, %c0_54, %c0_55] : memref<9x8x8xf32, #tpu.memory_space<vmem>>, vector<1x8x8xf32>
    %103 = vector.shape_cast %102 : vector<1x8x8xf32> to vector<8x8xf32>
    %cst_56 = arith.constant dense<0.000000e+00> : vector<8x256xf32>
    %104 = tpu.matmul %103, %101, %cst_56 {dimension_numbers = #tpu.dot_dimension_numbers<[1], [0], [0], [1], [0, 0, 1, 1], [], []>} : vector<8x8xf32>, vector<8x256xf32>, vector<8x256xf32> -> vector<8x256xf32>
    %c16_i32_57 = arith.constant 16 : i32
    %105 = tpu.dynamic_rotate %98 by %c16_i32_57 dim 1 : vector<8x256xf32>, i32 -> vector<8x256xf32>
    %106 = vector.broadcast %3 : vector<1x256xf32> to vector<8x256xf32>
    %107 = arith.mulf %105, %106 : vector<8x256xf32>
    %c1_58 = arith.constant 1 : index
    %c0_59 = arith.constant 0 : index
    %c0_60 = arith.constant 0 : index
    %108 = vector.load %arg7[%c1_58, %c0_59, %c0_60] : memref<9x8x8xf32, #tpu.memory_space<vmem>>, vector<1x8x8xf32>
    %109 = vector.shape_cast %108 : vector<1x8x8xf32> to vector<8x8xf32>
    %cst_61 = arith.constant dense<0.000000e+00> : vector<8x256xf32>
    %110 = tpu.matmul %109, %107, %cst_61 {dimension_numbers = #tpu.dot_dimension_numbers<[1], [0], [0], [1], [0, 0, 1, 1], [], []>} : vector<8x8xf32>, vector<8x256xf32>, vector<8x256xf32> -> vector<8x256xf32>
    %111 = arith.addf %104, %110 : vector<8x256xf32>
    %c15_i32_62 = arith.constant 15 : i32
    %112 = tpu.dynamic_rotate %98 by %c15_i32_62 dim 1 : vector<8x256xf32>, i32 -> vector<8x256xf32>
    %113 = vector.broadcast %5 : vector<1x256xf32> to vector<8x256xf32>
    %114 = arith.mulf %112, %113 : vector<8x256xf32>
    %c2_63 = arith.constant 2 : index
    %c0_64 = arith.constant 0 : index
    %c0_65 = arith.constant 0 : index
    %115 = vector.load %arg7[%c2_63, %c0_64, %c0_65] : memref<9x8x8xf32, #tpu.memory_space<vmem>>, vector<1x8x8xf32>
    %116 = vector.shape_cast %115 : vector<1x8x8xf32> to vector<8x8xf32>
    %cst_66 = arith.constant dense<0.000000e+00> : vector<8x256xf32>
    %117 = tpu.matmul %116, %114, %cst_66 {dimension_numbers = #tpu.dot_dimension_numbers<[1], [0], [0], [1], [0, 0, 1, 1], [], []>} : vector<8x8xf32>, vector<8x256xf32>, vector<8x256xf32> -> vector<8x256xf32>
    %118 = arith.addf %111, %117 : vector<8x256xf32>
    %c1_i32_67 = arith.constant 1 : i32
    %119 = tpu.dynamic_rotate %98 by %c1_i32_67 dim 1 : vector<8x256xf32>, i32 -> vector<8x256xf32>
    %120 = vector.broadcast %7 : vector<1x256xf32> to vector<8x256xf32>
    %121 = arith.mulf %119, %120 : vector<8x256xf32>
    %c3_68 = arith.constant 3 : index
    %c0_69 = arith.constant 0 : index
    %c0_70 = arith.constant 0 : index
    %122 = vector.load %arg7[%c3_68, %c0_69, %c0_70] : memref<9x8x8xf32, #tpu.memory_space<vmem>>, vector<1x8x8xf32>
    %123 = vector.shape_cast %122 : vector<1x8x8xf32> to vector<8x8xf32>
    %cst_71 = arith.constant dense<0.000000e+00> : vector<8x256xf32>
    %124 = tpu.matmul %123, %121, %cst_71 {dimension_numbers = #tpu.dot_dimension_numbers<[1], [0], [0], [1], [0, 0, 1, 1], [], []>} : vector<8x8xf32>, vector<8x256xf32>, vector<8x256xf32> -> vector<8x256xf32>
    %125 = arith.addf %118, %124 : vector<8x256xf32>
    %c4_72 = arith.constant 4 : index
    %c0_73 = arith.constant 0 : index
    %c0_74 = arith.constant 0 : index
    %126 = vector.load %arg7[%c4_72, %c0_73, %c0_74] : memref<9x8x8xf32, #tpu.memory_space<vmem>>, vector<1x8x8xf32>
    %127 = vector.shape_cast %126 : vector<1x8x8xf32> to vector<8x8xf32>
    %cst_75 = arith.constant dense<0.000000e+00> : vector<8x256xf32>
    %128 = tpu.matmul %127, %98, %cst_75 {dimension_numbers = #tpu.dot_dimension_numbers<[1], [0], [0], [1], [0, 0, 1, 1], [], []>} : vector<8x8xf32>, vector<8x256xf32>, vector<8x256xf32> -> vector<8x256xf32>
    %129 = arith.addf %125, %128 : vector<8x256xf32>
    %c255_i32_76 = arith.constant 255 : i32
    %130 = tpu.dynamic_rotate %98 by %c255_i32_76 dim 1 : vector<8x256xf32>, i32 -> vector<8x256xf32>
    %131 = vector.broadcast %9 : vector<1x256xf32> to vector<8x256xf32>
    %132 = arith.mulf %130, %131 : vector<8x256xf32>
    %c5_77 = arith.constant 5 : index
    %c0_78 = arith.constant 0 : index
    %c0_79 = arith.constant 0 : index
    %133 = vector.load %arg7[%c5_77, %c0_78, %c0_79] : memref<9x8x8xf32, #tpu.memory_space<vmem>>, vector<1x8x8xf32>
    %134 = vector.shape_cast %133 : vector<1x8x8xf32> to vector<8x8xf32>
    %cst_80 = arith.constant dense<0.000000e+00> : vector<8x256xf32>
    %135 = tpu.matmul %134, %132, %cst_80 {dimension_numbers = #tpu.dot_dimension_numbers<[1], [0], [0], [1], [0, 0, 1, 1], [], []>} : vector<8x8xf32>, vector<8x256xf32>, vector<8x256xf32> -> vector<8x256xf32>
    %136 = arith.addf %129, %135 : vector<8x256xf32>
    %c241_i32_81 = arith.constant 241 : i32
    %137 = tpu.dynamic_rotate %98 by %c241_i32_81 dim 1 : vector<8x256xf32>, i32 -> vector<8x256xf32>
    %138 = vector.broadcast %11 : vector<1x256xf32> to vector<8x256xf32>
    %139 = arith.mulf %137, %138 : vector<8x256xf32>
    %c6_82 = arith.constant 6 : index
    %c0_83 = arith.constant 0 : index
    %c0_84 = arith.constant 0 : index
    %140 = vector.load %arg7[%c6_82, %c0_83, %c0_84] : memref<9x8x8xf32, #tpu.memory_space<vmem>>, vector<1x8x8xf32>
    %141 = vector.shape_cast %140 : vector<1x8x8xf32> to vector<8x8xf32>
    %cst_85 = arith.constant dense<0.000000e+00> : vector<8x256xf32>
    %142 = tpu.matmul %141, %139, %cst_85 {dimension_numbers = #tpu.dot_dimension_numbers<[1], [0], [0], [1], [0, 0, 1, 1], [], []>} : vector<8x8xf32>, vector<8x256xf32>, vector<8x256xf32> -> vector<8x256xf32>
    %143 = arith.addf %136, %142 : vector<8x256xf32>
    %c240_i32_86 = arith.constant 240 : i32
    %144 = tpu.dynamic_rotate %98 by %c240_i32_86 dim 1 : vector<8x256xf32>, i32 -> vector<8x256xf32>
    %145 = vector.broadcast %13 : vector<1x256xf32> to vector<8x256xf32>
    %146 = arith.mulf %144, %145 : vector<8x256xf32>
    %c7_87 = arith.constant 7 : index
    %c0_88 = arith.constant 0 : index
    %c0_89 = arith.constant 0 : index
    %147 = vector.load %arg7[%c7_87, %c0_88, %c0_89] : memref<9x8x8xf32, #tpu.memory_space<vmem>>, vector<1x8x8xf32>
    %148 = vector.shape_cast %147 : vector<1x8x8xf32> to vector<8x8xf32>
    %cst_90 = arith.constant dense<0.000000e+00> : vector<8x256xf32>
    %149 = tpu.matmul %148, %146, %cst_90 {dimension_numbers = #tpu.dot_dimension_numbers<[1], [0], [0], [1], [0, 0, 1, 1], [], []>} : vector<8x8xf32>, vector<8x256xf32>, vector<8x256xf32> -> vector<8x256xf32>
    %150 = arith.addf %143, %149 : vector<8x256xf32>
    %c239_i32_91 = arith.constant 239 : i32
    %151 = tpu.dynamic_rotate %98 by %c239_i32_91 dim 1 : vector<8x256xf32>, i32 -> vector<8x256xf32>
    %152 = vector.broadcast %15 : vector<1x256xf32> to vector<8x256xf32>
    %153 = arith.mulf %151, %152 : vector<8x256xf32>
    %c8_92 = arith.constant 8 : index
    %c0_93 = arith.constant 0 : index
    %c0_94 = arith.constant 0 : index
    %154 = vector.load %arg7[%c8_92, %c0_93, %c0_94] : memref<9x8x8xf32, #tpu.memory_space<vmem>>, vector<1x8x8xf32>
    %155 = vector.shape_cast %154 : vector<1x8x8xf32> to vector<8x8xf32>
    %cst_95 = arith.constant dense<0.000000e+00> : vector<8x256xf32>
    %156 = tpu.matmul %155, %153, %cst_95 {dimension_numbers = #tpu.dot_dimension_numbers<[1], [0], [0], [1], [0, 0, 1, 1], [], []>} : vector<8x8xf32>, vector<8x256xf32>, vector<8x256xf32> -> vector<8x256xf32>
    %157 = arith.addf %150, %156 : vector<8x256xf32>
    %cst_96 = arith.constant 5.000000e-01 : f32
    %158 = vector.broadcast %cst_96 : f32 to vector<8x256xf32>
    %159 = arith.mulf %158, %157 : vector<8x256xf32>
    %cst_97 = arith.constant 0.707106769 : f32
    %160 = vector.broadcast %cst_97 : f32 to vector<8x256xf32>
    %161 = arith.mulf %157, %160 : vector<8x256xf32>
    %162 = math.erf %161 : vector<8x256xf32>
    %cst_98 = arith.constant 1.000000e+00 : f32
    %163 = vector.broadcast %cst_98 : f32 to vector<8x256xf32>
    %164 = arith.addf %163, %162 : vector<8x256xf32>
    %165 = arith.mulf %159, %164 : vector<8x256xf32>
    %c0_99 = arith.constant 0 : index
    %c0_100 = arith.constant 0 : index
    %166 = vector.load %arg8[%c0_99, %c0_100] : memref<8x8xf32, #tpu.memory_space<vmem>>, vector<8x8xf32>
    %cst_101 = arith.constant dense<0.000000e+00> : vector<8x256xf32>
    %167 = tpu.matmul %166, %165, %cst_101 {dimension_numbers = #tpu.dot_dimension_numbers<[1], [0], [0], [1], [0, 0, 1, 1], [], []>} : vector<8x8xf32>, vector<8x256xf32>, vector<8x256xf32> -> vector<8x256xf32>
    %c17_i32_102 = arith.constant 17 : i32
    %168 = tpu.dynamic_rotate %167 by %c17_i32_102 dim 1 : vector<8x256xf32>, i32 -> vector<8x256xf32>
    %169 = vector.broadcast %1 : vector<1x256xf32> to vector<8x256xf32>
    %170 = arith.mulf %168, %169 : vector<8x256xf32>
    %c0_103 = arith.constant 0 : index
    %c0_104 = arith.constant 0 : index
    %c0_105 = arith.constant 0 : index
    %171 = vector.load %arg9[%c0_103, %c0_104, %c0_105] : memref<9x8x1xf32, #tpu.memory_space<vmem>>, vector<1x8x1xf32>
    %172 = vector.shape_cast %171 : vector<1x8x1xf32> to vector<8x1xf32>
    %173 = vector.broadcast %172 : vector<8x1xf32> to vector<8x256xf32>
    %174 = arith.mulf %170, %173 : vector<8x256xf32>
    %c16_i32_106 = arith.constant 16 : i32
    %175 = tpu.dynamic_rotate %167 by %c16_i32_106 dim 1 : vector<8x256xf32>, i32 -> vector<8x256xf32>
    %176 = vector.broadcast %3 : vector<1x256xf32> to vector<8x256xf32>
    %177 = arith.mulf %175, %176 : vector<8x256xf32>
    %c1_107 = arith.constant 1 : index
    %c0_108 = arith.constant 0 : index
    %c0_109 = arith.constant 0 : index
    %178 = vector.load %arg9[%c1_107, %c0_108, %c0_109] : memref<9x8x1xf32, #tpu.memory_space<vmem>>, vector<1x8x1xf32>
    %179 = vector.shape_cast %178 : vector<1x8x1xf32> to vector<8x1xf32>
    %180 = vector.broadcast %179 : vector<8x1xf32> to vector<8x256xf32>
    %181 = arith.mulf %177, %180 : vector<8x256xf32>
    %182 = arith.addf %174, %181 : vector<8x256xf32>
    %c15_i32_110 = arith.constant 15 : i32
    %183 = tpu.dynamic_rotate %167 by %c15_i32_110 dim 1 : vector<8x256xf32>, i32 -> vector<8x256xf32>
    %184 = vector.broadcast %5 : vector<1x256xf32> to vector<8x256xf32>
    %185 = arith.mulf %183, %184 : vector<8x256xf32>
    %c2_111 = arith.constant 2 : index
    %c0_112 = arith.constant 0 : index
    %c0_113 = arith.constant 0 : index
    %186 = vector.load %arg9[%c2_111, %c0_112, %c0_113] : memref<9x8x1xf32, #tpu.memory_space<vmem>>, vector<1x8x1xf32>
    %187 = vector.shape_cast %186 : vector<1x8x1xf32> to vector<8x1xf32>
    %188 = vector.broadcast %187 : vector<8x1xf32> to vector<8x256xf32>
    %189 = arith.mulf %185, %188 : vector<8x256xf32>
    %190 = arith.addf %182, %189 : vector<8x256xf32>
    %c1_i32_114 = arith.constant 1 : i32
    %191 = tpu.dynamic_rotate %167 by %c1_i32_114 dim 1 : vector<8x256xf32>, i32 -> vector<8x256xf32>
    %192 = vector.broadcast %7 : vector<1x256xf32> to vector<8x256xf32>
    %193 = arith.mulf %191, %192 : vector<8x256xf32>
    %c3_115 = arith.constant 3 : index
    %c0_116 = arith.constant 0 : index
    %c0_117 = arith.constant 0 : index
    %194 = vector.load %arg9[%c3_115, %c0_116, %c0_117] : memref<9x8x1xf32, #tpu.memory_space<vmem>>, vector<1x8x1xf32>
    %195 = vector.shape_cast %194 : vector<1x8x1xf32> to vector<8x1xf32>
    %196 = vector.broadcast %195 : vector<8x1xf32> to vector<8x256xf32>
    %197 = arith.mulf %193, %196 : vector<8x256xf32>
    %198 = arith.addf %190, %197 : vector<8x256xf32>
    %c4_118 = arith.constant 4 : index
    %c0_119 = arith.constant 0 : index
    %c0_120 = arith.constant 0 : index
    %199 = vector.load %arg9[%c4_118, %c0_119, %c0_120] : memref<9x8x1xf32, #tpu.memory_space<vmem>>, vector<1x8x1xf32>
    %200 = vector.shape_cast %199 : vector<1x8x1xf32> to vector<8x1xf32>
    %201 = vector.broadcast %200 : vector<8x1xf32> to vector<8x256xf32>
    %202 = arith.mulf %167, %201 : vector<8x256xf32>
    %203 = arith.addf %198, %202 : vector<8x256xf32>
    %c255_i32_121 = arith.constant 255 : i32
    %204 = tpu.dynamic_rotate %167 by %c255_i32_121 dim 1 : vector<8x256xf32>, i32 -> vector<8x256xf32>
    %205 = vector.broadcast %9 : vector<1x256xf32> to vector<8x256xf32>
    %206 = arith.mulf %204, %205 : vector<8x256xf32>
    %c5_122 = arith.constant 5 : index
    %c0_123 = arith.constant 0 : index
    %c0_124 = arith.constant 0 : index
    %207 = vector.load %arg9[%c5_122, %c0_123, %c0_124] : memref<9x8x1xf32, #tpu.memory_space<vmem>>, vector<1x8x1xf32>
    %208 = vector.shape_cast %207 : vector<1x8x1xf32> to vector<8x1xf32>
    %209 = vector.broadcast %208 : vector<8x1xf32> to vector<8x256xf32>
    %210 = arith.mulf %206, %209 : vector<8x256xf32>
    %211 = arith.addf %203, %210 : vector<8x256xf32>
    %c241_i32_125 = arith.constant 241 : i32
    %212 = tpu.dynamic_rotate %167 by %c241_i32_125 dim 1 : vector<8x256xf32>, i32 -> vector<8x256xf32>
    %213 = vector.broadcast %11 : vector<1x256xf32> to vector<8x256xf32>
    %214 = arith.mulf %212, %213 : vector<8x256xf32>
    %c6_126 = arith.constant 6 : index
    %c0_127 = arith.constant 0 : index
    %c0_128 = arith.constant 0 : index
    %215 = vector.load %arg9[%c6_126, %c0_127, %c0_128] : memref<9x8x1xf32, #tpu.memory_space<vmem>>, vector<1x8x1xf32>
    %216 = vector.shape_cast %215 : vector<1x8x1xf32> to vector<8x1xf32>
    %217 = vector.broadcast %216 : vector<8x1xf32> to vector<8x256xf32>
    %218 = arith.mulf %214, %217 : vector<8x256xf32>
    %219 = arith.addf %211, %218 : vector<8x256xf32>
    %c240_i32_129 = arith.constant 240 : i32
    %220 = tpu.dynamic_rotate %167 by %c240_i32_129 dim 1 : vector<8x256xf32>, i32 -> vector<8x256xf32>
    %221 = vector.broadcast %13 : vector<1x256xf32> to vector<8x256xf32>
    %222 = arith.mulf %220, %221 : vector<8x256xf32>
    %c7_130 = arith.constant 7 : index
    %c0_131 = arith.constant 0 : index
    %c0_132 = arith.constant 0 : index
    %223 = vector.load %arg9[%c7_130, %c0_131, %c0_132] : memref<9x8x1xf32, #tpu.memory_space<vmem>>, vector<1x8x1xf32>
    %224 = vector.shape_cast %223 : vector<1x8x1xf32> to vector<8x1xf32>
    %225 = vector.broadcast %224 : vector<8x1xf32> to vector<8x256xf32>
    %226 = arith.mulf %222, %225 : vector<8x256xf32>
    %227 = arith.addf %219, %226 : vector<8x256xf32>
    %c239_i32_133 = arith.constant 239 : i32
    %228 = tpu.dynamic_rotate %167 by %c239_i32_133 dim 1 : vector<8x256xf32>, i32 -> vector<8x256xf32>
    %229 = vector.broadcast %15 : vector<1x256xf32> to vector<8x256xf32>
    %230 = arith.mulf %228, %229 : vector<8x256xf32>
    %c8_134 = arith.constant 8 : index
    %c0_135 = arith.constant 0 : index
    %c0_136 = arith.constant 0 : index
    %231 = vector.load %arg9[%c8_134, %c0_135, %c0_136] : memref<9x8x1xf32, #tpu.memory_space<vmem>>, vector<1x8x1xf32>
    %232 = vector.shape_cast %231 : vector<1x8x1xf32> to vector<8x1xf32>
    %233 = vector.broadcast %232 : vector<8x1xf32> to vector<8x256xf32>
    %234 = arith.mulf %230, %233 : vector<8x256xf32>
    %235 = arith.addf %227, %234 : vector<8x256xf32>
    %c0_137 = arith.constant 0 : index
    %c0_138 = arith.constant 0 : index
    %236 = vector.load %arg10[%c0_137, %c0_138] : memref<8x1xf32, #tpu.memory_space<vmem>>, vector<8x1xf32>
    %237 = vector.broadcast %236 : vector<8x1xf32> to vector<8x256xf32>
    %238 = arith.addf %235, %237 : vector<8x256xf32>
    %cst_139 = arith.constant 5.000000e-01 : f32
    %239 = vector.broadcast %cst_139 : f32 to vector<8x256xf32>
    %240 = arith.mulf %239, %238 : vector<8x256xf32>
    %cst_140 = arith.constant 0.707106769 : f32
    %241 = vector.broadcast %cst_140 : f32 to vector<8x256xf32>
    %242 = arith.mulf %238, %241 : vector<8x256xf32>
    %243 = math.erf %242 : vector<8x256xf32>
    %cst_141 = arith.constant 1.000000e+00 : f32
    %244 = vector.broadcast %cst_141 : f32 to vector<8x256xf32>
    %245 = arith.addf %244, %243 : vector<8x256xf32>
    %246 = arith.mulf %240, %245 : vector<8x256xf32>
    %c0_142 = arith.constant 0 : index
    %c0_143 = arith.constant 0 : index
    %247 = vector.load %arg11[%c0_142, %c0_143] : memref<8x8xf32, #tpu.memory_space<vmem>>, vector<8x8xf32>
    %248 = arith.addf %246, %17 : vector<8x256xf32>
    %cst_144 = arith.constant dense<0.000000e+00> : vector<8x256xf32>
    %249 = tpu.matmul %247, %248, %cst_144 {dimension_numbers = #tpu.dot_dimension_numbers<[1], [0], [0], [1], [0, 0, 1, 1], [], []>} : vector<8x8xf32>, vector<8x256xf32>, vector<8x256xf32> -> vector<8x256xf32>
    %c0_145 = arith.constant 0 : index
    %c0_146 = arith.constant 0 : index
    %250 = vector.load %arg12[%c0_145, %c0_146] : memref<16x8xf32, #tpu.memory_space<vmem>>, vector<16x8xf32>
    %cst_147 = arith.constant dense<0.000000e+00> : vector<16x256xf32>
    %251 = tpu.matmul %250, %249, %cst_147 {dimension_numbers = #tpu.dot_dimension_numbers<[1], [0], [0], [1], [0, 0, 1, 1], [], []>} : vector<16x8xf32>, vector<8x256xf32>, vector<16x256xf32> -> vector<16x256xf32>
    %c0_148 = arith.constant 0 : index
    %c0_149 = arith.constant 0 : index
    %252 = vector.load %arg13[%c0_148, %c0_149] : memref<16x1xf32, #tpu.memory_space<vmem>>, vector<16x1xf32>
    %253 = vector.broadcast %252 : vector<16x1xf32> to vector<16x256xf32>
    %254 = arith.addf %251, %253 : vector<16x256xf32>
    %c0_150 = arith.constant 0 : index
    %c0_151 = arith.constant 0 : index
    %c0_152 = arith.constant 0 : index
    %255 = vector.load %arg14[%c0_150, %c0_151, %c0_152] : memref<9x16x16xf32, #tpu.memory_space<vmem>>, vector<1x16x16xf32>
    %256 = vector.shape_cast %255 : vector<1x16x16xf32> to vector<16x16xf32>
    %cst_153 = arith.constant dense<0.000000e+00> : vector<16x256xf32>
    %257 = tpu.matmul %256, %254, %cst_153 {dimension_numbers = #tpu.dot_dimension_numbers<[1], [0], [0], [1], [0, 0, 1, 1], [], []>} : vector<16x16xf32>, vector<16x256xf32>, vector<16x256xf32> -> vector<16x256xf32>
    %c1_154 = arith.constant 1 : index
    %c0_155 = arith.constant 0 : index
    %c0_156 = arith.constant 0 : index
    %258 = vector.load %arg14[%c1_154, %c0_155, %c0_156] : memref<9x16x16xf32, #tpu.memory_space<vmem>>, vector<1x16x16xf32>
    %259 = vector.shape_cast %258 : vector<1x16x16xf32> to vector<16x16xf32>
    %c255_i32_157 = arith.constant 255 : i32
    %260 = tpu.dynamic_rotate %254 by %c255_i32_157 dim 1 : vector<16x256xf32>, i32 -> vector<16x256xf32>
    %cst_158 = arith.constant dense<0.000000e+00> : vector<16x256xf32>
    %261 = tpu.matmul %259, %260, %cst_158 {dimension_numbers = #tpu.dot_dimension_numbers<[1], [0], [0], [1], [0, 0, 1, 1], [], []>} : vector<16x16xf32>, vector<16x256xf32>, vector<16x256xf32> -> vector<16x256xf32>
    %262 = arith.addf %257, %261 : vector<16x256xf32>
    %c2_159 = arith.constant 2 : index
    %c0_160 = arith.constant 0 : index
    %c0_161 = arith.constant 0 : index
    %263 = vector.load %arg14[%c2_159, %c0_160, %c0_161] : memref<9x16x16xf32, #tpu.memory_space<vmem>>, vector<1x16x16xf32>
    %264 = vector.shape_cast %263 : vector<1x16x16xf32> to vector<16x16xf32>
    %c254_i32 = arith.constant 254 : i32
    %265 = tpu.dynamic_rotate %254 by %c254_i32 dim 1 : vector<16x256xf32>, i32 -> vector<16x256xf32>
    %cst_162 = arith.constant dense<0.000000e+00> : vector<16x256xf32>
    %266 = tpu.matmul %264, %265, %cst_162 {dimension_numbers = #tpu.dot_dimension_numbers<[1], [0], [0], [1], [0, 0, 1, 1], [], []>} : vector<16x16xf32>, vector<16x256xf32>, vector<16x256xf32> -> vector<16x256xf32>
    %267 = arith.addf %262, %266 : vector<16x256xf32>
    %c3_163 = arith.constant 3 : index
    %c0_164 = arith.constant 0 : index
    %c0_165 = arith.constant 0 : index
    %268 = vector.load %arg14[%c3_163, %c0_164, %c0_165] : memref<9x16x16xf32, #tpu.memory_space<vmem>>, vector<1x16x16xf32>
    %269 = vector.shape_cast %268 : vector<1x16x16xf32> to vector<16x16xf32>
    %c240_i32_166 = arith.constant 240 : i32
    %270 = tpu.dynamic_rotate %254 by %c240_i32_166 dim 1 : vector<16x256xf32>, i32 -> vector<16x256xf32>
    %cst_167 = arith.constant dense<0.000000e+00> : vector<16x256xf32>
    %271 = tpu.matmul %269, %270, %cst_167 {dimension_numbers = #tpu.dot_dimension_numbers<[1], [0], [0], [1], [0, 0, 1, 1], [], []>} : vector<16x16xf32>, vector<16x256xf32>, vector<16x256xf32> -> vector<16x256xf32>
    %272 = arith.addf %267, %271 : vector<16x256xf32>
    %c4_168 = arith.constant 4 : index
    %c0_169 = arith.constant 0 : index
    %c0_170 = arith.constant 0 : index
    %273 = vector.load %arg14[%c4_168, %c0_169, %c0_170] : memref<9x16x16xf32, #tpu.memory_space<vmem>>, vector<1x16x16xf32>
    %274 = vector.shape_cast %273 : vector<1x16x16xf32> to vector<16x16xf32>
    %c239_i32_171 = arith.constant 239 : i32
    %275 = tpu.dynamic_rotate %254 by %c239_i32_171 dim 1 : vector<16x256xf32>, i32 -> vector<16x256xf32>
    %cst_172 = arith.constant dense<0.000000e+00> : vector<16x256xf32>
    %276 = tpu.matmul %274, %275, %cst_172 {dimension_numbers = #tpu.dot_dimension_numbers<[1], [0], [0], [1], [0, 0, 1, 1], [], []>} : vector<16x16xf32>, vector<16x256xf32>, vector<16x256xf32> -> vector<16x256xf32>
    %277 = arith.addf %272, %276 : vector<16x256xf32>
    %c5_173 = arith.constant 5 : index
    %c0_174 = arith.constant 0 : index
    %c0_175 = arith.constant 0 : index
    %278 = vector.load %arg14[%c5_173, %c0_174, %c0_175] : memref<9x16x16xf32, #tpu.memory_space<vmem>>, vector<1x16x16xf32>
    %279 = vector.shape_cast %278 : vector<1x16x16xf32> to vector<16x16xf32>
    %c238_i32 = arith.constant 238 : i32
    %280 = tpu.dynamic_rotate %254 by %c238_i32 dim 1 : vector<16x256xf32>, i32 -> vector<16x256xf32>
    %cst_176 = arith.constant dense<0.000000e+00> : vector<16x256xf32>
    %281 = tpu.matmul %279, %280, %cst_176 {dimension_numbers = #tpu.dot_dimension_numbers<[1], [0], [0], [1], [0, 0, 1, 1], [], []>} : vector<16x16xf32>, vector<16x256xf32>, vector<16x256xf32> -> vector<16x256xf32>
    %282 = arith.addf %277, %281 : vector<16x256xf32>
    %c6_177 = arith.constant 6 : index
    %c0_178 = arith.constant 0 : index
    %c0_179 = arith.constant 0 : index
    %283 = vector.load %arg14[%c6_177, %c0_178, %c0_179] : memref<9x16x16xf32, #tpu.memory_space<vmem>>, vector<1x16x16xf32>
    %284 = vector.shape_cast %283 : vector<1x16x16xf32> to vector<16x16xf32>
    %c224_i32 = arith.constant 224 : i32
    %285 = tpu.dynamic_rotate %254 by %c224_i32 dim 1 : vector<16x256xf32>, i32 -> vector<16x256xf32>
    %cst_180 = arith.constant dense<0.000000e+00> : vector<16x256xf32>
    %286 = tpu.matmul %284, %285, %cst_180 {dimension_numbers = #tpu.dot_dimension_numbers<[1], [0], [0], [1], [0, 0, 1, 1], [], []>} : vector<16x16xf32>, vector<16x256xf32>, vector<16x256xf32> -> vector<16x256xf32>
    %287 = arith.addf %282, %286 : vector<16x256xf32>
    %c7_181 = arith.constant 7 : index
    %c0_182 = arith.constant 0 : index
    %c0_183 = arith.constant 0 : index
    %288 = vector.load %arg14[%c7_181, %c0_182, %c0_183] : memref<9x16x16xf32, #tpu.memory_space<vmem>>, vector<1x16x16xf32>
    %289 = vector.shape_cast %288 : vector<1x16x16xf32> to vector<16x16xf32>
    %c223_i32 = arith.constant 223 : i32
    %290 = tpu.dynamic_rotate %254 by %c223_i32 dim 1 : vector<16x256xf32>, i32 -> vector<16x256xf32>
    %cst_184 = arith.constant dense<0.000000e+00> : vector<16x256xf32>
    %291 = tpu.matmul %289, %290, %cst_184 {dimension_numbers = #tpu.dot_dimension_numbers<[1], [0], [0], [1], [0, 0, 1, 1], [], []>} : vector<16x16xf32>, vector<16x256xf32>, vector<16x256xf32> -> vector<16x256xf32>
    %292 = arith.addf %287, %291 : vector<16x256xf32>
    %c8_185 = arith.constant 8 : index
    %c0_186 = arith.constant 0 : index
    %c0_187 = arith.constant 0 : index
    %293 = vector.load %arg14[%c8_185, %c0_186, %c0_187] : memref<9x16x16xf32, #tpu.memory_space<vmem>>, vector<1x16x16xf32>
    %294 = vector.shape_cast %293 : vector<1x16x16xf32> to vector<16x16xf32>
    %c222_i32 = arith.constant 222 : i32
    %295 = tpu.dynamic_rotate %254 by %c222_i32 dim 1 : vector<16x256xf32>, i32 -> vector<16x256xf32>
    %cst_188 = arith.constant dense<0.000000e+00> : vector<16x256xf32>
    %296 = tpu.matmul %294, %295, %cst_188 {dimension_numbers = #tpu.dot_dimension_numbers<[1], [0], [0], [1], [0, 0, 1, 1], [], []>} : vector<16x16xf32>, vector<16x256xf32>, vector<16x256xf32> -> vector<16x256xf32>
    %297 = arith.addf %292, %296 : vector<16x256xf32>
    %cst_189 = arith.constant 0xFF800000 : f32
    %298 = vector.broadcast %cst_189 : f32 to vector<16x256xf32>
    %c0_190 = arith.constant 0 : index
    %c0_191 = arith.constant 0 : index
    %299 = vector.load %arg3[%c0_190, %c0_191] : memref<1x256xf32, #tpu.memory_space<vmem>>, vector<1x256xf32>
    %cst_192 = arith.constant 5.000000e-01 : f32
    %300 = vector.broadcast %cst_192 : f32 to vector<1x256xf32>
    %301 = arith.cmpf ogt, %299, %300 : vector<1x256xf32>
    %302 = vector.shape_cast %301 : vector<1x256xi1> to vector<1x256xi1>
    %303 = vector.broadcast %302 : vector<1x256xi1> to vector<16x256xi1>
    %304 = arith.select %303, %297, %298 : vector<16x256xi1>, vector<16x256xf32>
    %cst_193 = arith.constant dense<0xFF800000> : vector<16xf32>
    %305 = vector.multi_reduction <maximumf>, %304, %cst_193 [1] : vector<16x256xf32> to vector<16xf32>
    %306 = vector.shape_cast %305 : vector<16xf32> to vector<16x1xf32>
    %c0_194 = arith.constant 0 : index
    %c0_195 = arith.constant 0 : index
    %307 = vector.load %arg15[%c0_194, %c0_195] : memref<16x1xf32, #tpu.memory_space<vmem>>, vector<16x1xf32>
    %308 = arith.addf %306, %307 : vector<16x1xf32>
    %c0_196 = arith.constant 0 : index
    %c0_197 = arith.constant 0 : index
    %309 = vector.load %arg16[%c0_196, %c0_197] : memref<16x16xf32, #tpu.memory_space<vmem>>, vector<16x16xf32>
    %310 = vector.shape_cast %308 : vector<16x1xf32> to vector<16x1xf32>
    %311 = vector.broadcast %310 : vector<16x1xf32> to vector<16x256xf32>
    %cst_198 = arith.constant dense<0.000000e+00> : vector<16x256xf32>
    %312 = tpu.matmul %309, %311, %cst_198 {dimension_numbers = #tpu.dot_dimension_numbers<[1], [0], [0], [1], [0, 0, 1, 1], [], []>} : vector<16x16xf32>, vector<16x256xf32>, vector<16x256xf32> -> vector<16x256xf32>
    %c0_199 = arith.constant 0 : index
    %c0_200 = arith.constant 0 : index
    %313 = vector.load %arg17[%c0_199, %c0_200] : memref<16x1xf32, #tpu.memory_space<vmem>>, vector<16x1xf32>
    %314 = vector.broadcast %313 : vector<16x1xf32> to vector<16x256xf32>
    %315 = arith.addf %312, %314 : vector<16x256xf32>
    %c0_201 = arith.constant 0 : index
    %c0_202 = arith.constant 0 : index
    %316 = vector.load %arg18[%c0_201, %c0_202] : memref<16x16xf32, #tpu.memory_space<vmem>>, vector<16x16xf32>
    %cst_203 = arith.constant dense<0.000000e+00> : vector<16x256xf32>
    %317 = tpu.matmul %316, %254, %cst_203 {dimension_numbers = #tpu.dot_dimension_numbers<[1], [0], [0], [1], [0, 0, 1, 1], [], []>} : vector<16x16xf32>, vector<16x256xf32>, vector<16x256xf32> -> vector<16x256xf32>
    %c0_204 = arith.constant 0 : index
    %c0_205 = arith.constant 0 : index
    %318 = vector.load %arg19[%c0_204, %c0_205] : memref<16x1xf32, #tpu.memory_space<vmem>>, vector<16x1xf32>
    %319 = vector.broadcast %318 : vector<16x1xf32> to vector<16x256xf32>
    %320 = arith.addf %317, %319 : vector<16x256xf32>
    %c0_206 = arith.constant 0 : index
    %c0_207 = arith.constant 0 : index
    %321 = vector.load %arg20[%c0_206, %c0_207] : memref<8x16xf32, #tpu.memory_space<vmem>>, vector<8x16xf32>
    %322 = arith.addf %315, %320 : vector<16x256xf32>
    %cst_208 = arith.constant dense<0.000000e+00> : vector<8x256xf32>
    %323 = tpu.matmul %321, %322, %cst_208 {dimension_numbers = #tpu.dot_dimension_numbers<[1], [0], [0], [1], [0, 0, 1, 1], [], []>} : vector<8x16xf32>, vector<16x256xf32>, vector<8x256xf32> -> vector<8x256xf32>
    %c0_209 = arith.constant 0 : index
    %c0_210 = arith.constant 0 : index
    %324 = vector.load %arg21[%c0_209, %c0_210] : memref<8x1xf32, #tpu.memory_space<vmem>>, vector<8x1xf32>
    %325 = vector.broadcast %324 : vector<8x1xf32> to vector<8x256xf32>
    %326 = arith.addf %323, %325 : vector<8x256xf32>
    %327 = arith.negf %326 : vector<8x256xf32>
    %328 = math.exp %327 : vector<8x256xf32>
    %cst_211 = arith.constant 1.000000e+00 : f32
    %329 = vector.broadcast %cst_211 : f32 to vector<8x256xf32>
    %330 = arith.addf %329, %328 : vector<8x256xf32>
    %331 = arith.divf %329, %330 : vector<8x256xf32>
    %332 = arith.mulf %249, %331 : vector<8x256xf32>
    %c0_212 = arith.constant 0 : index
    %c0_213 = arith.constant 0 : index
    %c0_214 = arith.constant 0 : index
    %333 = vector.load %arg22[%c0_212, %c0_213, %c0_214] : memref<1x8x256xf32, #tpu.memory_space<vmem>>, vector<1x8x256xf32>
    %334 = vector.shape_cast %333 : vector<1x8x256xf32> to vector<8x256xf32>
    %335 = vector.shape_cast %332 : vector<8x256xf32> to vector<1x8x256xf32>
    tpu.vector_store %arg22[%c0_212, %c0_213, %c0_214], %335 {strides = array<i32>} : memref<1x8x256xf32, #tpu.memory_space<vmem>>, vector<1x8x256xf32>,
    return
  }
  func.func @transform_0(%arg0: i32) -> (i32, i32, i32) {
    %c0_i32 = arith.constant 0 : i32
    %c0_i32_0 = arith.constant 0 : i32
    %c0_i32_1 = arith.constant 0 : i32
    return %arg0, %c0_i32, %c0_i32_0 : i32, i32, i32
  }
  func.func @transform_1(%arg0: i32) -> (i32, i32, i32) {
    %c0_i32 = arith.constant 0 : i32
    %c0_i32_0 = arith.constant 0 : i32
    %c0_i32_1 = arith.constant 0 : i32
    %c0_i32_2 = arith.constant 0 : i32
    return %c0_i32, %c0_i32_0, %c0_i32_1 : i32, i32, i32
  }
  func.func @transform_2(%arg0: i32) -> (i32, i32) {
    %c0_i32 = arith.constant 0 : i32
    %c0_i32_0 = arith.constant 0 : i32
    %c0_i32_1 = arith.constant 0 : i32
    return %c0_i32, %c0_i32_0 : i32, i32
  }
  func.func @transform_3(%arg0: i32) -> (i32, i32) {
    %c0_i32 = arith.constant 0 : i32
    %c0_i32_0 = arith.constant 0 : i32
    %c0_i32_1 = arith.constant 0 : i32
    return %c0_i32, %c0_i32_0 : i32, i32
  }
  func.func @transform_4(%arg0: i32) -> (i32, i32, i32) {
    %c0_i32 = arith.constant 0 : i32
    %c0_i32_0 = arith.constant 0 : i32
    %c0_i32_1 = arith.constant 0 : i32
    %c0_i32_2 = arith.constant 0 : i32
    return %c0_i32, %c0_i32_0, %c0_i32_1 : i32, i32, i32
  }
  func.func @transform_5(%arg0: i32) -> (i32, i32) {
    %c0_i32 = arith.constant 0 : i32
    %c0_i32_0 = arith.constant 0 : i32
    %c0_i32_1 = arith.constant 0 : i32
    return %c0_i32, %c0_i32_0 : i32, i32
  }
  func.func @transform_6(%arg0: i32) -> (i32, i32, i32) {
    %c0_i32 = arith.constant 0 : i32
    %c0_i32_0 = arith.constant 0 : i32
    %c0_i32_1 = arith.constant 0 : i32
    %c0_i32_2 = arith.constant 0 : i32
    return %c0_i32, %c0_i32_0, %c0_i32_1 : i32, i32, i32
  }
  func.func @transform_7(%arg0: i32) -> (i32, i32) {
    %c0_i32 = arith.constant 0 : i32
    %c0_i32_0 = arith.constant 0 : i32
    %c0_i32_1 = arith.constant 0 : i32
    return %c0_i32, %c0_i32_0 : i32, i32
  }
  func.func @transform_8(%arg0: i32) -> (i32, i32, i32) {
    %c0_i32 = arith.constant 0 : i32
    %c0_i32_0 = arith.constant 0 : i32
    %c0_i32_1 = arith.constant 0 : i32
    %c0_i32_2 = arith.constant 0 : i32
    return %c0_i32, %c0_i32_0, %c0_i32_1 : i32, i32, i32
  }
  func.func @transform_9(%arg0: i32) -> (i32, i32) {
    %c0_i32 = arith.constant 0 : i32
    %c0_i32_0 = arith.constant 0 : i32
    %c0_i32_1 = arith.constant 0 : i32
    return %c0_i32, %c0_i32_0 : i32, i32
  }
  func.func @transform_10(%arg0: i32) -> (i32, i32) {
    %c0_i32 = arith.constant 0 : i32
    %c0_i32_0 = arith.constant 0 : i32
    %c0_i32_1 = arith.constant 0 : i32
    return %c0_i32, %c0_i32_0 : i32, i32
  }
  func.func @transform_11(%arg0: i32) -> (i32, i32) {
    %c0_i32 = arith.constant 0 : i32
    %c0_i32_0 = arith.constant 0 : i32
    %c0_i32_1 = arith.constant 0 : i32
    return %c0_i32, %c0_i32_0 : i32, i32
  }
  func.func @transform_12(%arg0: i32) -> (i32, i32) {
    %c0_i32 = arith.constant 0 : i32
    %c0_i32_0 = arith.constant 0 : i32
    %c0_i32_1 = arith.constant 0 : i32
    return %c0_i32, %c0_i32_0 : i32, i32
  }
  func.func @transform_13(%arg0: i32) -> (i32, i32, i32) {
    %c0_i32 = arith.constant 0 : i32
    %c0_i32_0 = arith.constant 0 : i32
    %c0_i32_1 = arith.constant 0 : i32
    %c0_i32_2 = arith.constant 0 : i32
    return %c0_i32, %c0_i32_0, %c0_i32_1 : i32, i32, i32
  }
  func.func @transform_14(%arg0: i32) -> (i32, i32) {
    %c0_i32 = arith.constant 0 : i32
    %c0_i32_0 = arith.constant 0 : i32
    %c0_i32_1 = arith.constant 0 : i32
    return %c0_i32, %c0_i32_0 : i32, i32
  }
  func.func @transform_15(%arg0: i32) -> (i32, i32) {
    %c0_i32 = arith.constant 0 : i32
    %c0_i32_0 = arith.constant 0 : i32
    %c0_i32_1 = arith.constant 0 : i32
    return %c0_i32, %c0_i32_0 : i32, i32
  }
  func.func @transform_16(%arg0: i32) -> (i32, i32) {
    %c0_i32 = arith.constant 0 : i32
    %c0_i32_0 = arith.constant 0 : i32
    %c0_i32_1 = arith.constant 0 : i32
    return %c0_i32, %c0_i32_0 : i32, i32
  }
  func.func @transform_17(%arg0: i32) -> (i32, i32) {
    %c0_i32 = arith.constant 0 : i32
    %c0_i32_0 = arith.constant 0 : i32
    %c0_i32_1 = arith.constant 0 : i32
    return %c0_i32, %c0_i32_0 : i32, i32
  }
  func.func @transform_18(%arg0: i32) -> (i32, i32) {
    %c0_i32 = arith.constant 0 : i32
    %c0_i32_0 = arith.constant 0 : i32
    %c0_i32_1 = arith.constant 0 : i32
    return %c0_i32, %c0_i32_0 : i32, i32
  }
  func.func @transform_19(%arg0: i32) -> (i32, i32) {
    %c0_i32 = arith.constant 0 : i32
    %c0_i32_0 = arith.constant 0 : i32
    %c0_i32_1 = arith.constant 0 : i32
    return %c0_i32, %c0_i32_0 : i32, i32
  }
  func.func @transform_20(%arg0: i32) -> (i32, i32) {
    %c0_i32 = arith.constant 0 : i32
    %c0_i32_0 = arith.constant 0 : i32
    %c0_i32_1 = arith.constant 0 : i32
    return %c0_i32, %c0_i32_0 : i32, i32
  }
  func.func @transform_21(%arg0: i32) -> (i32, i32, i32) {
    %c0_i32 = arith.constant 0 : i32
    %c0_i32_0 = arith.constant 0 : i32
    %c0_i32_1 = arith.constant 0 : i32
    return %arg0, %c0_i32, %c0_i32_0 : i32, i32, i32
  }
}

</mosaic_0001>

<bundles_post_ra>
// kernel: smrb_forward.1
= control target key start
LH: loop header
LB: loop body
LE: loop exit
PB: predicated region body
PF: predicated region fallthrough
CT: control target
= control target key end

     0   :  { %s4771_s0 = inlined_call_operand.vmem [shape: f32[2,8,256], index: 0, kind: input, shape index: {}]   ;;  %s4772_s1 = inlined_call_operand.vmem [shape: f32[9,1,256], index: 1, kind: input, shape index: {}]   ;;  %s4773_s2 = inlined_call_operand.vmem [shape: f32[1,256], index: 2, kind: input, shape index: {}]   ;;  %s4774_s3 = inlined_call_operand.vmem [shape: f32[8,8], index: 3, kind: input, shape index: {}]   ;;  %s4775_s4 = inlined_call_operand.vmem [shape: f32[9,8,1], index: 4, kind: input, shape index: {}]   ;;  %s4776_s5 = inlined_call_operand.vmem [shape: f32[8,1], index: 5, kind: input, shape index: {}]   ;;  %s4777_s6 = inlined_call_operand.vmem [shape: f32[9,8,8], index: 6, kind: input, shape index: {}]   ;;  %s4778_s7 = inlined_call_operand.vmem [shape: f32[8,8], index: 7, kind: input, shape index: {}]   ;;  %s4779_s8 = inlined_call_operand.vmem [shape: f32[9,8,1], index: 8, kind: input, shape index: {}]   ;;  %s4780_s9 = inlined_call_operand.vmem [shape: f32[8,1], index: 9, kind: input, shape index: {}]   ;;  %s4781_s10 = inlined_call_operand.vmem [shape: f32[8,8], index: 10, kind: input, shape index: {}]   ;;  %s4782_s11 = inlined_call_operand.vmem [shape: f32[16,8], index: 11, kind: input, shape index: {}]   ;;  %s4783_s12 = inlined_call_operand.vmem [shape: f32[16,1], index: 12, kind: input, shape index: {}]   ;;  %s4784_s13 = inlined_call_operand.vmem [shape: f32[9,16,16], index: 13, kind: input, shape index: {}]   ;;  %s4785_s14 = inlined_call_operand.vmem [shape: f32[16,1], index: 14, kind: input, shape index: {}]   ;;  %s4786_s15 = inlined_call_operand.vmem [shape: f32[16,16], index: 15, kind: input, shape index: {}]   ;;  %s4787_s16 = inlined_call_operand.vmem [shape: f32[16,1], index: 16, kind: input, shape index: {}]   ;;  %s4788_s17 = inlined_call_operand.vmem [shape: f32[16,16], index: 17, kind: input, shape index: {}]   ;;  %s4789_s18 = inlined_call_operand.vmem [shape: f32[16,1], index: 18, kind: input, shape index: {}]   ;;  %s4790_s19 = inlined_call_operand.vmem [shape: f32[8,16], index: 19, kind: input, shape index: {}]   ;;  %s4791_s20 = inlined_call_operand.vmem [shape: f32[8,1], index: 20, kind: input, shape index: {}]   ;;  %s4792_s21 = inlined_call_operand.vmem [shape: f32[2,8,256], index: 21, kind: output, shape index: {}]  }
   0x1   :  { %4814 = sst [smem:[#allocation2_spill]] %s4771_s0 }
   0x2   :  { %4815 = sst [smem:[#allocation3_spill]] %s4772_s1 }
   0x3   :  { %4816 = sst [smem:[#allocation4_spill]] %s4773_s2  ;;  %s3984_s2 = smov 0  }
   0x4   :  { %4817 = sst [smem:[#allocation5_spill]] %s4774_s3 }
   0x5   :  { %4818 = sst [smem:[#allocation6_spill]] %s4775_s4 }
   0x6   :  { %4819 = sst [smem:[#allocation7_spill]] %s4776_s5 }
   0x7 LB: > { %s3514_s25 = sadd.s32 4294967295, %s3857_s2   ;;  %p3518_p0 = scmp.ge.s32.totalorder %s3857_s2, 1  ;;  %s3857_s2 = sphi %s3984_s2, %s31_s2  }
   0x8   : > { %p587_p1 = scmp.lt.s32.totalorder %s3857_s2, 3 }
   0xa   : > { %p588_p2 = pnand %p3518_p0, %p587_p1 }
   0xb   : > { %p647_p3 = scmp.lt.s32.totalorder (!%p588_p2), %s3514_s25, 1  ;;  %s4820_s3 = sld [smem:[#allocation6_spill]] (!%p588_p2)  ;;  %v3859_v1 = vmov (!%p588_p2), 0.0   ;;  %v3860_v2 = vmov (!%p588_p2), 0   ;;  %vm675_vm0 = vcmask (!%p588_p2), 64512   ;;  %v754_v28 = vlaneseq (!%p588_p2) }
   0xc   : > { %591 = sbr.rel (%p588_p2) target bundleno = 2818 (0xb02), region = 104  ;;  %743 = vmatprep.mubr.f32.mxu0 (!%p588_p2), %v3859_v1  ;;  %3744 = vset.pattern.permute.xlu0 (!%p588_p2), %v3860_v2  ;;  %s4821_s24 = sld [smem:[#allocation2_spill]] (!%p588_p2)  ;;  %vm2241_vm9 = vcmask (!%p588_p2), 130048  }
   0xd   : > { %3745 = vset.pattern.permute.xlu1 (!%p588_p2), %v3860_v2  ;;  %1112 = vmatprep.mubr.f32.mxu1 (!%p588_p2), %v3859_v1  ;;  %s4822_s29 = sld [smem:[#allocation5_spill]] (!%p588_p2)  ;;  %s4808_s0 = smov (!%p588_p2), 17   ;;  %v761_v31 = vshrl.u32 (!%p588_p2), %v754_v28, 7  ;;  %v4097_v32 = vand.u32 (!%p588_p2), 127, %v754_v28 }
   0xe   : > { %s4800_s4 = smov (!%p588_p2), 113   ;;  %s4806_s5 = smov (!%p588_p2), 16  }
   0xf   : > { %s4804_s22 = smov (!%p588_p2), 1   ;;  %s4802_s23 = smov (!%p588_p2), 127   ;;  %v4099_v34 = vsub.s32 (!%p588_p2), 0, %v761_v31  ;;  %v4101_v35 = vsub.s32 (!%p588_p2), 1, %v761_v31  ;;  %vm756_vm1 = vcmp.lt.s32.totalorder (!%p588_p2), %v4097_v32, 17  ;;  %vm784_vm2 = vcmp.lt.s32.totalorder (!%p588_p2), %v4097_v32, 16 }
  0x10   : > { %s4798_s1 = smov (!%p588_p2), 112   ;;  %s4823_s28 = sld [smem:[#allocation7_spill]] (!%p588_p2)  ;;  %vm846_vm3 = vcmp.lt.s32.totalorder (!%p588_p2), %v4097_v32, 1  ;;  %vm815_vm4 = vcmp.lt.s32.totalorder (!%p588_p2), %v4097_v32, 15  ;;  %vm888_vm5 = vcmp.lt.s32.totalorder (!%p588_p2), %v4097_v32, 127  ;;  %vm919_vm6 = vcmp.lt.s32.totalorder (!%p588_p2), %v4097_v32, 113 }
  0x11   : > { %v772_v0 = vld [vmem:[%s4820_s3] sm:$0xff] (!%p588_p2)  ;;  %v3532_v3 = vld [vmem:[%s4820_s3 + $0x10] sm:$0xff] (!%p588_p2)  ;;  %v3531_v4 = vld [vmem:[%s4820_s3 + $0x8] sm:$0xff] (!%p588_p2)  ;;  %vm950_vm7 = vcmp.lt.s32.totalorder (!%p588_p2), %v4097_v32, 112  ;;  %vm981_vm8 = vcmp.lt.s32.totalorder (!%p588_p2), %v4097_v32, 111  ;;  %vm2419_vm10 = vcmp.lt.s32.totalorder (!%p588_p2), %v4097_v32, 126 }
  0x12   : > { %775 = vperm.xlu0 (!%p588_p2), %3744, %v772_v0   ;;  %835 = vperm.xlu1 (!%p588_p2), %3745, %v3532_v3   ;;  %v3533_v5 = vld [vmem:[%s4820_s3 + $0x18] sm:$0xff] (!%p588_p2)  ;;  %v3534_v9 = vld [vmem:[%s4820_s3 + $0x20] sm:$0xff] (!%p588_p2)  ;;  %v3535_v10 = vld [vmem:[%s4820_s3 + $0x28] sm:$0xff] (!%p588_p2)  ;;  %vm2726_vm11 = vcmp.lt.s32.totalorder (!%p588_p2), %v4097_v32, 110  ;;  %vm2829_vm12 = vcmp.lt.s32.totalorder (!%p588_p2), %v4097_v32, 96  ;;  %vm2932_vm13 = vcmp.lt.s32.totalorder (!%p588_p2), %v4097_v32, 95 }
  0x13   : > { %s4836_s25 = smov (!%p647_p3, %s3514_s25), 1  ;;  %v674_v8 = vld [vmem:[%s4822_s29] sm:$0xff]  ;;  %v3536_v11 = vld [vmem:[%s4820_s3 + $0x30] sm:$0xff]  ;;  %v3537_v12 = vld [vmem:[%s4820_s3 + $0x38] sm:$0xff]  ;;  %s4810_s29 = smov 15   ;;  %vm3035_vm14 = vcmp.lt.s32.totalorder %v4097_v32, 94 }
  0x14   : > { %s4795_s30 = sshll.u32 %s4836_s25, 4  ;;  %v3538_v13 = vld [vmem:[%s4820_s3 + $0x40] sm:$0xff]  ;;  %s4828_s3 = smov 15  }
  0x15   : > { %s651_s26 = scalar_lea.vmem %s4821_s24, %s4795_s30  ;;  %s4796_s24 = smov 111   ;;  %v3598_v32 = vld [vmem:[%s4784_s13 + $0x80] sm:$0xff] }
  0x16   : > { %v4016_v6 = vld [vmem:[%s651_s26 + $0x8] sm:$0xff]  ;;  %v4018_v7 = vld [vmem:[%s651_s26] sm:$0xff]  ;;  %804 = vperm.xlu0 %3744, %v3531_v4   ;;  %866 = vperm.xlu1 %3745, %v3533_v5   ;;  %s4827_s30 = smov 111   ;;  %s4831_s26 = smov 1  }
  0x17   : > { %679 = vmatprep.subr.mxu0 %v4016_v6  ;;  %v1008_v16 = vld [vmem:[%s4823_s28] sm:$0xff]  ;;  %s4824_s28 = sld [smem:[#allocation3_spill]] }
  0x18   : > { %680 = vmatpush1.msra.mxu0 %v4018_v7 }
  0x19   : > { %3530 = vmatmul.mubr.msk.f32.vlgmr.msra.gmra.mrb[0].mxu0 %vm675_vm0, %v674_v8 }
  0x1a   : > { %877 = vperm.xlu0 %3744, %v3534_v9   ;;  %1865 = vmatprep.mubr.f32.mxu0 %v3859_v1 }
  0x1b   : > { %908 = vperm.xlu1 %3745, %v3535_v10  }
  0x1d   : > { %v657_v37 = vld [vmem:[%s4824_s28] sm:$0x3]  ;;  %v3523_v38 = vld [vmem:[%s4824_s28 + $0x2] sm:$0x3]  ;;  %v3525_v49 = vld [vmem:[%s4824_s28 + $0x6] sm:$0x3] }
  0x1e   : > { %939 = vperm.xlu0 %3744, %v3536_v11   ;;  %v4112_v39 = vrot.slane %v657_v37, %v4099_v34  ;;  %v4115_v40 = vrot.slane %v657_v37, %v4101_v35  ;;  %v4118_v42 = vrot.slane %v3523_v38, %v4099_v34  ;;  %v4121_v43 = vrot.slane %v3523_v38, %v4101_v35  ;;  %v3524_v50 = vld [vmem:[%s4824_s28 + $0x4] sm:$0x3]  ;;  %v3526_v57 = vld [vmem:[%s4824_s28 + $0xa] sm:$0x3]  ;;  %v3527_v31 = vld [vmem:[%s4824_s28 + $0xc] sm:$0x3] }
  0x1f   : > { %970 = vperm.xlu1 %3745, %v3537_v12   ;;  %v4146_v58 = vrot.slane %v3525_v49, %v4099_v34  ;;  %v4149_v59 = vrot.slane %v3525_v49, %v4101_v35  ;;  %v4157_v62 = vrot.slane %v3524_v50, %v4099_v34  ;;  %v4160_v63 = vrot.slane %v3524_v50, %v4101_v35 }
  0x20   : > { %v4164_v0 = vrot.slane %v3526_v57, %v4099_v34  ;;  %v4167_v3 = vrot.slane %v3526_v57, %v4101_v35 }
  0x22   : > { %1001 = vperm.xlu0 %3744, %v3538_v13  }
  0x91   : > { %v776_v17 = vpop.permute.xlu0 %775  ;;  %v4081_v18 = vpop.permute.xlu1 %835 }
  0x95   : > { %v805_v19 = vpop.permute.xlu0 %804  ;;  %v4083_v20 = vpop.permute.xlu1 %866 }
  0x99   : > { %v4085_v21 = vpop.permute.xlu0 %877 }
  0x9a   : > { %v4087_v22 = vpop.permute.xlu1 %908 }
  0x9d   : > { %v4089_v23 = vpop.permute.xlu0 %939 }
  0x9e   : > { %v4091_v24 = vpop.permute.xlu1 %970 }
  0xa1   : > { %v4093_v25 = vpop.permute.xlu0 %1001 }
  0xec   : > { %v4042_v14 = vpop.f32.mrb[0].mxu0 }
  0xed   : > { %811 = vrot.lane.b32.xlu0 %v4042_v14, %s4810_s29  ;;  %750 = vrot.lane.b32.xlu1 %v4042_v14, %s4808_s0  ;;  %v4048_v15 = vpop.f32.mrb[1].mxu0 }
  0xf1   : > { %915 = vrot.lane.b32.xlu0 %v4042_v14, %s4800_s4  ;;  %780 = vrot.lane.b32.xlu1 %v4042_v14, %s4806_s5 }
  0xf5   : > { %842 = vrot.lane.b32.xlu1 %v4042_v14, %s4804_s22  ;;  %752 = vrot.lane.b32.xlu0 %v4048_v15, %s4808_s0 }
  0xf9   : > { %884 = vrot.lane.b32.xlu1 %v4042_v14, %s4802_s23  ;;  %782 = vrot.lane.b32.xlu0 %v4048_v15, %s4806_s5 }
  0xfd   : > { %946 = vrot.lane.b32.xlu1 %v4042_v14, %s4798_s1  ;;  %844 = vrot.lane.b32.xlu0 %v4048_v15, %s4804_s22 }
 0x101   : > { %813 = vrot.lane.b32.xlu1 %v4048_v15, %s4810_s29  ;;  %886 = vrot.lane.b32.xlu0 %v4048_v15, %s4802_s23 }
 0x105   : > { %977 = vrot.lane.b32.xlu1 %v4042_v14, %s4796_s24  ;;  %948 = vrot.lane.b32.xlu0 %v4048_v15, %s4798_s1  ;;  %s4826_s1 = smov 112  }
 0x109   : > { %917 = vrot.lane.b32.xlu1 %v4048_v15, %s4800_s4  ;;  %979 = vrot.lane.b32.xlu0 %v4048_v15, %s4796_s24  ;;  %s4825_s4 = smov 113   ;;  %s4830_s24 = smov 16  }
 0x10d   : > { %1011 = vperm.xlu1 %3745, %v1008_v16  }
 0x15f   : > { %v812_v26 = vpop.permute.xlu0 %811  ;;  %v751_v27 = vpop.permute.xlu1 %750 }
 0x163   : > { %v4095_v29 = vpop.permute.xlu0 %915  ;;  %v781_v30 = vpop.permute.xlu1 %780 }
 0x167   : > { %v843_v33 = vpop.permute.xlu1 %842  ;;  %v753_v36 = vpop.permute.xlu0 %752 }
 0x168   : > { %v757_v45 = vsel %vm756_vm1, %v751_v27, %v753_v36  ;;  %v758_v46 = vsel %vm756_vm1, %v753_v36, %v751_v27 }
 0x169   : > { %v770_v51 = vmul.f32 %v4112_v39, %v758_v46  ;;  %v771_v52 = vmul.f32 %v4115_v40, %v757_v45  ;;  %v4193_v46 = vrot.slane %v3527_v31, %v4099_v34 }
 0x16b   : > { %v885_v41 = vpop.permute.xlu1 %884  ;;  %v783_v44 = vpop.permute.xlu0 %782  ;;  %v778_v4 = vmul.f32 %v776_v17, %v770_v51  ;;  %v779_v5 = vmul.f32 %v776_v17, %v771_v52  ;;  %v880_v52 = vmul.f32 %v4085_v21, %v4042_v14 }
 0x16c   : > { %v785_v47 = vsel %vm784_vm2, %v781_v30, %v783_v44  ;;  %v786_v48 = vsel %vm784_vm2, %v783_v44, %v781_v30 }
 0x16d   : > { %v798_v53 = vmul.f32 %v4118_v42, %v786_v48  ;;  %v799_v54 = vmul.f32 %v4121_v43, %v785_v47  ;;  %v4196_v47 = vrot.slane %v3527_v31, %v4101_v35 }
 0x16f   : > { %v947_v55 = vpop.permute.xlu1 %946  ;;  %v845_v56 = vpop.permute.xlu0 %844  ;;  %v807_v8 = vmul.f32 %v805_v19, %v798_v53  ;;  %v808_v9 = vmul.f32 %v805_v19, %v799_v54  ;;  %v881_v53 = vmul.f32 %v4085_v21, %v4048_v15 }
 0x170   : > { %v847_v60 = vsel %vm846_vm3, %v843_v33, %v845_v56  ;;  %v848_v61 = vsel %vm846_vm3, %v845_v56, %v843_v33 }
 0x171   : > { %v860_v12 = vmul.f32 %v4146_v58, %v848_v61  ;;  %v861_v13 = vmul.f32 %v4149_v59, %v847_v60  ;;  %v809_v33 = vadd.f32 %v807_v8, %v778_v4  ;;  %v810_v36 = vadd.f32 %v808_v9, %v779_v5 }
 0x173   : > { %v814_v10 = vpop.permute.xlu1 %813  ;;  %v887_v11 = vpop.permute.xlu0 %886  ;;  %v869_v48 = vmul.f32 %v4083_v20, %v860_v12  ;;  %v870_v49 = vmul.f32 %v4083_v20, %v861_v13 }
 0x174   : > { %v816_v16 = vsel %vm815_vm4, %v812_v26, %v814_v10  ;;  %v817_v27 = vsel %vm815_vm4, %v814_v10, %v812_v26  ;;  %v889_v17 = vsel %vm888_vm5, %v885_v41, %v887_v11  ;;  %v890_v19 = vsel %vm888_vm5, %v887_v11, %v885_v41  ;;  %v3528_v41 = vld [vmem:[%s4824_s28 + $0xe] sm:$0x3]  ;;  %v3529_v11 = vld [vmem:[%s4824_s28 + $0x10] sm:$0x3]  ;;  %s4829_s28 = smov 17  }
 0x175   : > { %v829_v28 = vmul.f32 %v4157_v62, %v817_v27  ;;  %v830_v30 = vmul.f32 %v4160_v63, %v816_v16  ;;  %v902_v44 = vmul.f32 %v4164_v0, %v889_v17  ;;  %v903_v45 = vmul.f32 %v4167_v3, %v890_v19 }
 0x176   : > { %v4206_v57 = vrot.slane %v3528_v41, %v4099_v34  ;;  %v4209_v60 = vrot.slane %v3528_v41, %v4101_v35  ;;  %v4234_v17 = vrot.slane %v3529_v11, %v4099_v34 }
 0x177   : > { %v838_v26 = vmul.f32 %v4081_v18, %v829_v28  ;;  %v839_v37 = vmul.f32 %v4081_v18, %v830_v30  ;;  %v978_v38 = vpop.permute.xlu1 %977  ;;  %v949_v51 = vpop.permute.xlu0 %948  ;;  %v911_v61 = vmul.f32 %v4087_v22, %v902_v44  ;;  %v912_v4 = vmul.f32 %v4087_v22, %v903_v45 }
 0x178   : > { %v951_v10 = vsel %vm950_vm7, %v947_v55, %v949_v51  ;;  %v952_v22 = vsel %vm950_vm7, %v949_v51, %v947_v55  ;;  %v4237_v55 = vrot.slane %v3529_v11, %v4101_v35  ;;  %v3562_v11 = vld [vmem:[%s4779_s8 + $0x30] sm:$0xff] }
 0x179   : > { %v840_v18 = vadd.f32 %v838_v26, %v809_v33  ;;  %v841_v50 = vadd.f32 %v839_v37, %v810_v36  ;;  %v964_v28 = vmul.f32 %v4206_v57, %v951_v10  ;;  %v965_v30 = vmul.f32 %v4209_v60, %v952_v22  ;;  %v3560_v10 = vld [vmem:[%s4779_s8 + $0x20] sm:$0xff]  ;;  %v3561_v22 = vld [vmem:[%s4779_s8 + $0x28] sm:$0xff] }
 0x17b   : > { %v871_v54 = vadd.f32 %v869_v48, %v840_v18  ;;  %v872_v56 = vadd.f32 %v870_v49, %v841_v50  ;;  %v918_v20 = vpop.permute.xlu1 %917  ;;  %v980_v27 = vpop.permute.xlu0 %979  ;;  %v974_v26 = vmul.f32 %v4091_v24, %v965_v30 }
 0x17c   : > { %v920_v14 = vsel %vm919_vm6, %v4095_v29, %v918_v20  ;;  %v921_v15 = vsel %vm919_vm6, %v918_v20, %v4095_v29  ;;  %v982_v19 = vsel %vm981_vm8, %v978_v38, %v980_v27  ;;  %v983_v31 = vsel %vm981_vm8, %v980_v27, %v978_v38 }
 0x17d   : > { %v882_v21 = vadd.f32 %v880_v52, %v871_v54  ;;  %v883_v5 = vadd.f32 %v881_v53, %v872_v56  ;;  %v933_v8 = vmul.f32 %v4193_v46, %v920_v14  ;;  %v934_v9 = vmul.f32 %v4196_v47, %v921_v15 }
 0x17e   : > { %v995_v37 = vmul.f32 %v4234_v17, %v982_v19  ;;  %v996_v44 = vmul.f32 %v4237_v55, %v983_v31 }
 0x17f   : > { %v913_v12 = vadd.f32 %v911_v61, %v882_v21  ;;  %v914_v29 = vadd.f32 %v912_v4, %v883_v5  ;;  %v942_v13 = vmul.f32 %v4089_v23, %v933_v8  ;;  %v943_v16 = vmul.f32 %v4089_v23, %v934_v9  ;;  %v3557_v5 = vld [vmem:[%s4779_s8 + $0x8] sm:$0xff]  ;;  %v3558_v8 = vld [vmem:[%s4779_s8 + $0x10] sm:$0xff]  ;;  %v3559_v9 = vld [vmem:[%s4779_s8 + $0x18] sm:$0xff] }
 0x180   : > { %v973_v23 = vmul.f32 %v4091_v24, %v964_v28  ;;  %v1004_v48 = vmul.f32 %v4093_v25, %v995_v37  ;;  %v1005_v49 = vmul.f32 %v4093_v25, %v996_v44  ;;  %v1880_v25 = vld [vmem:[%s4779_s8] sm:$0xff] }
 0x181   : > { %v944_v33 = vadd.f32 %v942_v13, %v913_v12  ;;  %v945_v36 = vadd.f32 %v943_v16, %v914_v29  ;;  %v3563_v12 = vld [vmem:[%s4779_s8 + $0x38] sm:$0xff]  ;;  %v3564_v29 = vld [vmem:[%s4779_s8 + $0x40] sm:$0xff] }
 0x183   : > { %v975_v45 = vadd.f32 %v973_v23, %v944_v33  ;;  %v976_v41 = vadd.f32 %v974_v26, %v945_v36  ;;  %v3539_v33 = vld [vmem:[%s4777_s6 + $0x8] sm:$0xff] }
 0x185   : > { %v1006_v18 = vadd.f32 %v1004_v48, %v975_v45  ;;  %v1007_v50 = vadd.f32 %v1005_v49, %v976_v41 }
 0x18c   : > { %v1012_v51 = vpop.permute.xlu1 %1011 }
 0x18d   : > { %v1014_v38 = vadd.f32 %v1012_v51, %v1006_v18  ;;  %v1015_v52 = vadd.f32 %v1012_v51, %v1007_v50  ;;  %v1034_v51 = vld [vmem:[%s4777_s6] sm:$0xff] }
 0x18f   : > { %v1018_v53 = vmul.f32 0.70710677, %v1014_v38  ;;  %v1019_v54 = vmul.f32 0.70710677, %v1015_v52  ;;  %v1016_v20 = vmul.f32 0.5, %v1014_v38  ;;  %v1017_v4 = vmul.f32 0.5, %v1015_v52 }
 0x191   : > { %3831 = verf.f32 %v1018_v53 }
 0x192   : > { %3833 = verf.f32 %v1019_v54 }
 0x19b   : > { %v3832_v24 = vpop.eup %3831 }
 0x19c   : > { %v3834_v56 = vpop.eup %3833  ;;  %v1022_v61 = vadd.f32 1.0, %v3832_v24 }
 0x19d   : > { %v1023_v14 = vadd.f32 1.0, %v3834_v56  ;;  %v3542_v56 = vld [vmem:[%s4777_s6 + $0x10] sm:$0xff] }
 0x19e   : > { %v4249_v15 = vmul.f32 %v1022_v61, %v1016_v20 }
 0x19f   : > { %v4251_v21 = vmul.f32 %v1023_v14, %v1017_v4 }
 0x1a0   : > { %1035 = vrot.lane.b32.xlu0 %v4249_v15, %s4806_s5 }
 0x1a1   : > { %1037 = vrot.lane.b32.xlu1 %v4251_v21, %s4806_s5 }
 0x1a4   : > { %1026 = vrot.lane.b32.xlu0 %v4249_v15, %s4808_s0 }
 0x1a5   : > { %1028 = vrot.lane.b32.xlu1 %v4251_v21, %s4808_s0 }
 0x1a8   : > { %1193 = vrot.lane.b32.xlu0 %v4249_v15, %s4810_s29 }
 0x1a9   : > { %1195 = vrot.lane.b32.xlu1 %v4251_v21, %s4810_s29 }
 0x1ac   : > { %1279 = vrot.lane.b32.xlu0 %v4249_v15, %s4804_s22 }
 0x1ad   : > { %1281 = vrot.lane.b32.xlu1 %v4251_v21, %s4804_s22  ;;  %s3869_s22 = smov 126  }
 0x1b0   : > { %1443 = vrot.lane.b32.xlu0 %v4249_v15, %s4802_s23 }
 0x1b1   : > { %1445 = vrot.lane.b32.xlu1 %v4251_v21, %s4802_s23  ;;  %s4832_s23 = smov 127  }
 0x1b4   : > { %1529 = vrot.lane.b32.xlu0 %v4249_v15, %s4825_s4 }
 0x1b5   : > { %1531 = vrot.lane.b32.xlu1 %v4251_v21, %s4825_s4 }
 0x1b8   : > { %1615 = vrot.lane.b32.xlu0 %v4249_v15, %s4826_s1 }
 0x1b9   : > { %1617 = vrot.lane.b32.xlu1 %v4251_v21, %s4826_s1 }
 0x1bc   : > { %1701 = vrot.lane.b32.xlu0 %v4249_v15, %s4827_s30 }
 0x1bd   : > { %1703 = vrot.lane.b32.xlu1 %v4251_v21, %s4827_s30 }
 0x1c0   : > { %1883 = vperm.xlu0 %3744, %v1880_v25   ;;  %v3544_v25 = vld [vmem:[%s4777_s6 + $0x18] sm:$0xff] }
 0x1c1   : > { %1900 = vperm.xlu1 %3745, %v3557_v5  }
 0x1c4   : > { %1919 = vperm.xlu0 %3744, %v3558_v8  }
 0x1c5   : > { %1938 = vperm.xlu1 %3745, %v3559_v9  }
 0x1c8   : > { %1949 = vperm.xlu0 %3744, %v3560_v10  }
 0x1c9   : > { %1968 = vperm.xlu1 %3745, %v3561_v22   ;;  %v3546_v22 = vld [vmem:[%s4777_s6 + $0x20] sm:$0xff] }
 0x1cc   : > { %1987 = vperm.xlu0 %3744, %v3562_v11  }
 0x1cd   : > { %2006 = vperm.xlu1 %3745, %v3563_v12  }
 0x1d0   : > { %2025 = vperm.xlu0 %3744, %v3564_v29  }
 0x212   : > { %v1036_v13 = vpop.permute.xlu0 %1035 }
 0x213   : > { %v1038_v16 = vpop.permute.xlu1 %1037 }
 0x214   : > { %v1040_v27 = vsel %vm784_vm2, %v1038_v16, %v1036_v13  ;;  %v1039_v28 = vsel %vm784_vm2, %v1036_v13, %v1038_v16 }
 0x215   : > { %v1042_v30 = vmul.f32 %v1039_v28, %v4121_v43  ;;  %v1041_v19 = vmul.f32 %v1040_v27, %v4118_v42  ;;  %v3548_v27 = vld [vmem:[%s4777_s6 + $0x28] sm:$0xff] }
 0x216   : > { %v1027_v31 = vpop.permute.xlu0 %1026 }
 0x217   : > { %1048 = vmatprep.subr.mxu1 %v1042_v30  ;;  %v1029_v36 = vpop.permute.xlu1 %1028 }
 0x218   : > { %v1030_v23 = vsel %vm756_vm1, %v1027_v31, %v1029_v36  ;;  %v1031_v26 = vsel %vm756_vm1, %v1029_v36, %v1027_v31  ;;  %1049 = vmatpush1.msra.mxu1 %v1041_v19 }
 0x219   : > { %v1032_v37 = vmul.f32 %v1031_v26, %v4112_v39  ;;  %v1033_v44 = vmul.f32 %v1030_v23, %v4115_v40  ;;  %3540 = vmatmul.mubr.msk.f32.vlgmr.msra.gmra.mrb[0].mxu1 %vm675_vm0, %v3539_v33  ;;  %v3550_v23 = vld [vmem:[%s4777_s6 + $0x30] sm:$0xff] }
 0x21a   : > { %v1194_v45 = vpop.permute.xlu0 %1193  ;;  %1186 = vmatprep.mubr.f32.mxu1 %v3859_v1 }
 0x21b   : > { %1122 = vmatprep.subr.mxu1 %v1033_v44  ;;  %v1196_v41 = vpop.permute.xlu1 %1195 }
 0x21c   : > { %v1197_v48 = vsel %vm815_vm4, %v1194_v45, %v1196_v41  ;;  %1123 = vmatpush1.msra.mxu1 %v1032_v37  ;;  %v1198_v49 = vsel %vm815_vm4, %v1196_v41, %v1194_v45  ;;  %v3552_v45 = vld [vmem:[%s4777_s6 + $0x38] sm:$0xff] }
 0x21d   : > { %v1200_v18 = vmul.f32 %v1197_v48, %v4160_v63  ;;  %v1199_v52 = vmul.f32 %v1198_v49, %v4157_v62  ;;  %v3554_v48 = vld [vmem:[%s4777_s6 + $0x40] sm:$0xff] }
 0x21e   : > { %v1280_v50 = vpop.permute.xlu0 %1279 }
 0x21f   : > { %1206 = vmatprep.subr.mxu1 %v1200_v18  ;;  %v1282_v38 = vpop.permute.xlu1 %1281 }
 0x220   : > { %v1283_v53 = vsel %vm846_vm3, %v1280_v50, %v1282_v38  ;;  %v1284_v24 = vsel %vm846_vm3, %v1282_v38, %v1280_v50 }
 0x221   : > { %v1286_v54 = vmul.f32 %v1283_v53, %v4149_v59  ;;  %3541 = vmatmul.mubr.msk.f32.vlgmr.msra.gmra.mrb[0].mxu1 %vm675_vm0, %v1034_v51  ;;  %v1285_v20 = vmul.f32 %v1284_v24, %v4146_v58 }
 0x222   : > { %1207 = vmatpush1.msra.mxu1 %v1199_v52  ;;  %1270 = vmatprep.mubr.f32.mxu1 %v3859_v1  ;;  %v1444_v61 = vpop.permute.xlu0 %1443 }
 0x223   : > { %1292 = vmatprep.subr.mxu1 %v1286_v54  ;;  %v1446_v4 = vpop.permute.xlu1 %1445 }
 0x224   : > { %v1448_v14 = vsel %vm888_vm5, %v1446_v4, %v1444_v61 }
 0x225   : > { %v1450_v5 = vmul.f32 %v1448_v14, %v4167_v3 }
 0x226   : > { %v1530_v8 = vpop.permute.xlu0 %1529 }
 0x227   : > { %v1532_v9 = vpop.permute.xlu1 %1531 }
 0x228   : > { %v1534_v10 = vsel %vm919_vm6, %v1532_v9, %v1530_v8  ;;  %v1533_v13 = vsel %vm919_vm6, %v1530_v8, %v1532_v9  ;;  %v2129_v8 = vld [vmem:[%s4783_s12] sm:$0xff]  ;;  %v2130_v9 = vld [vmem:[%s4783_s12 + $0x8] sm:$0xff] }
 0x229   : > { %3543 = vmatmul.mubr.msk.f32.vlgmr.msra.gmra.mrb[0].mxu1 %vm675_vm0, %v3542_v56  ;;  %v1536_v12 = vmul.f32 %v1534_v10, %v4196_v47  ;;  %v1535_v28 = vmul.f32 %v1533_v13, %v4193_v46 }
 0x22a   : > { %1293 = vmatpush1.msra.mxu1 %v1285_v20  ;;  %1356 = vmatprep.mubr.f32.mxu1 %v3859_v1 }
 0x22b   : > { %1370 = vmatprep.subr.mxu1 %v4251_v21  ;;  %v1447_v21 = vsel %vm888_vm5, %v1444_v61, %v1446_v4  ;;  %v1618_v29 = vpop.permute.xlu1 %1617  ;;  %v1797_v4 = vld [vmem:[%s4778_s7] sm:$0xff] }
 0x22c   : > { %v1449_v11 = vmul.f32 %v1447_v21, %v4164_v0 }
 0x22f   : > { %v1704_v31 = vpop.permute.xlu1 %1703 }
 0x231   : > { %3545 = vmatmul.mubr.msk.f32.vlgmr.msra.gmra.mrb[0].mxu1 %vm675_vm0, %v3544_v25 }
 0x232   : > { %1371 = vmatpush1.msra.mxu1 %v4249_v15  ;;  %1434 = vmatprep.mubr.f32.mxu1 %v3859_v1  ;;  %v1616_v15 = vpop.permute.xlu0 %1615 }
 0x233   : > { %1456 = vmatprep.subr.mxu1 %v1450_v5  ;;  %v1620_v16 = vsel %vm950_vm7, %v1618_v29, %v1616_v15  ;;  %v1619_v33 = vsel %vm950_vm7, %v1616_v15, %v1618_v29  ;;  %v2032_v5 = vld [vmem:[%s4780_s9] sm:$0xff] }
 0x234   : > { %v1622_v30 = vmul.f32 %v1620_v16, %v4209_v60  ;;  %v1621_v26 = vmul.f32 %v1619_v33, %v4206_v57 }
 0x236   : > { %v1702_v19 = vpop.permute.xlu0 %1701 }
 0x237   : > { %v1706_v36 = vsel %vm981_vm8, %v1704_v31, %v1702_v19  ;;  %v1705_v44 = vsel %vm981_vm8, %v1702_v19, %v1704_v31 }
 0x238   : > { %v1708_v37 = vmul.f32 %v1706_v36, %v4237_v55  ;;  %v1707_v41 = vmul.f32 %v1705_v44, %v4234_v17 }
 0x239   : > { %3547 = vmatmul.mubr.msk.f32.vlgmr.msra.gmra.mrb[0].mxu1 %vm675_vm0, %v3546_v22 }
 0x23a   : > { %1457 = vmatpush1.msra.mxu1 %v1449_v11  ;;  %1520 = vmatprep.mubr.f32.mxu1 %v3859_v1 }
 0x23b   : > { %1542 = vmatprep.subr.mxu1 %v1536_v12 }
 0x23f   : > { %v1884_v21 = vpop.permute.xlu0 %1883 }
 0x240   : > { %v1901_v10 = vpop.permute.xlu1 %1900 }
 0x241   : > { %3549 = vmatmul.mubr.msk.f32.vlgmr.msra.gmra.mrb[0].mxu1 %vm675_vm0, %v3548_v27 }
 0x242   : > { %1543 = vmatpush1.msra.mxu1 %v1535_v28  ;;  %1606 = vmatprep.mubr.f32.mxu1 %v3859_v1 }
 0x243   : > { %1628 = vmatprep.subr.mxu1 %v1622_v30  ;;  %v1920_v22 = vpop.permute.xlu0 %1919 }
 0x244   : > { %v1939_v11 = vpop.permute.xlu1 %1938 }
 0x247   : > { %v1950_v12 = vpop.permute.xlu0 %1949 }
 0x248   : > { %v1969_v15 = vpop.permute.xlu1 %1968 }
 0x249   : > { %3551 = vmatmul.mubr.msk.f32.vlgmr.msra.gmra.mrb[0].mxu1 %vm675_vm0, %v3550_v23 }
 0x24a   : > { %1629 = vmatpush1.msra.mxu1 %v1621_v26  ;;  %1692 = vmatprep.mubr.f32.mxu1 %v3859_v1 }
 0x24b   : > { %1714 = vmatprep.subr.mxu1 %v1708_v37  ;;  %v4457_v29 = vpop.permute.xlu0 %1987 }
 0x24c   : > { %v4459_v13 = vpop.permute.xlu1 %2006 }
 0x24f   : > { %v4461_v16 = vpop.permute.xlu0 %2025 }
 0x251   : > { %3553 = vmatmul.mubr.msk.f32.vlgmr.msra.gmra.mrb[0].mxu1 %vm675_vm0, %v3552_v45 }
 0x252   : > { %1715 = vmatpush1.msra.mxu1 %v1707_v41  ;;  %1778 = vmatprep.mubr.f32.mxu1 %v3859_v1 }
 0x259   : > { %3555 = vmatmul.mubr.msk.f32.vlgmr.msra.gmra.mrb[0].mxu1 %vm675_vm0, %v3554_v48 }
 0x25a   : > { %2211 = vmatprep.mubr.f32.mxu1 %v3859_v1 }
 0x32c   : > { %v1780_v49 = vpop.f32.mrb[0].mxu1 }
 0x32d   : > { %v1789_v18 = vmul.f32 0.70710677, %v1780_v49  ;;  %v1782_v50 = vpop.f32.mrb[1].mxu1  ;;  %v1787_v56 = vmul.f32 0.5, %v1780_v49 }
 0x32e   : > { %v1790_v51 = vmul.f32 0.70710677, %v1782_v50  ;;  %v1788_v54 = vmul.f32 0.5, %v1782_v50 }
 0x32f   : > { %3835 = verf.f32 %v1789_v18 }
 0x330   : > { %3837 = verf.f32 %v1790_v51 }
 0x339   : > { %v3836_v38 = vpop.eup %3835 }
 0x33a   : > { %v3838_v52 = vpop.eup %3837  ;;  %v1793_v53 = vadd.f32 1.0, %v3836_v38 }
 0x33b   : > { %v1794_v24 = vadd.f32 1.0, %v3838_v52 }
 0x33c   : > { %v1795_v61 = vmul.f32 %v1793_v53, %v1787_v56 }
 0x33d   : > { %v1796_v20 = vmul.f32 %v1794_v24, %v1788_v54 }
 0x33f   : > { %1801 = vmatprep.subr.mxu0 %v1796_v20 }
 0x340   : > { %1802 = vmatpush1.msra.mxu0 %v1795_v61 }
 0x341   : > { %3556 = vmatmul.mubr.msk.f32.vlgmr.msra.gmra.mrb[2].mxu0 %vm675_vm0, %v1797_v4 }
 0x342   : > { %2120 = vmatprep.mubr.f32.mxu0 %v3859_v1 }
 0x414   : > { %v4412_v14 = vpop.f32.mrb[2].mxu0 }
 0x415   : > { %1907 = vrot.lane.b32.xlu0 %v4412_v14, %s4828_s3  ;;  %1872 = vrot.lane.b32.xlu1 %v4412_v14, %s4829_s28  ;;  %v4418_v25 = vpop.f32.mrb[3].mxu0 }
 0x419   : > { %1975 = vrot.lane.b32.xlu0 %v4412_v14, %s4825_s4  ;;  %1888 = vrot.lane.b32.xlu1 %v4412_v14, %s4830_s24 }
 0x41d   : > { %1926 = vrot.lane.b32.xlu1 %v4412_v14, %s4831_s26  ;;  %1874 = vrot.lane.b32.xlu0 %v4418_v25, %s4829_s28  ;;  %s3870_s28 = smov 110  }
 0x421   : > { %1956 = vrot.lane.b32.xlu1 %v4412_v14, %s4832_s23  ;;  %1890 = vrot.lane.b32.xlu0 %v4418_v25, %s4830_s24  ;;  %s3872_s24 = smov 95  }
 0x425   : > { %1994 = vrot.lane.b32.xlu1 %v4412_v14, %s4826_s1  ;;  %1928 = vrot.lane.b32.xlu0 %v4418_v25, %s4831_s26  ;;  %s3873_s26 = smov 94  }
 0x429   : > { %1909 = vrot.lane.b32.xlu1 %v4418_v25, %s4828_s3  ;;  %1958 = vrot.lane.b32.xlu0 %v4418_v25, %s4832_s23  ;;  %s4834_s3 = sshll.u32 %s4836_s25, 4 }
 0x42d   : > { %2013 = vrot.lane.b32.xlu1 %v4412_v14, %s4827_s30  ;;  %1996 = vrot.lane.b32.xlu0 %v4418_v25, %s4826_s1 }
 0x431   : > { %1977 = vrot.lane.b32.xlu1 %v4418_v25, %s4825_s4  ;;  %2015 = vrot.lane.b32.xlu0 %v4418_v25, %s4827_s30  ;;  %s4833_s4 = sld [smem:[#allocation4_spill]] }
 0x435   : > { %2035 = vperm.xlu1 %3745, %v2032_v5   ;;  %2133 = vperm.xlu0 %3744, %v2129_v8  }
 0x439   : > { %2138 = vperm.xlu1 %3745, %v2130_v9  }
 0x487   : > { %v1908_v27 = vpop.permute.xlu0 %1907  ;;  %v1873_v28 = vpop.permute.xlu1 %1872 }
 0x48b   : > { %v1976_v30 = vpop.permute.xlu0 %1975  ;;  %v1889_v19 = vpop.permute.xlu1 %1888 }
 0x48f   : > { %v1875_v31 = vpop.permute.xlu0 %1874  ;;  %v1927_v33 = vpop.permute.xlu1 %1926 }
 0x490   : > { %v1876_v44 = vsel %vm756_vm1, %v1873_v28, %v1875_v31  ;;  %v1877_v45 = vsel %vm756_vm1, %v1875_v31, %v1873_v28 }
 0x491   : > { %v1878_v50 = vmul.f32 %v1877_v45, %v4112_v39  ;;  %v1879_v51 = vmul.f32 %v1876_v44, %v4115_v40  ;;  %v1952_v44 = vmul.f32 %v1950_v12, %v4412_v14 }
 0x493   : > { %v1891_v36 = vpop.permute.xlu0 %1890  ;;  %v1957_v23 = vpop.permute.xlu1 %1956  ;;  %v1886_v40 = vmul.f32 %v1884_v21, %v1878_v50  ;;  %v1887_v61 = vmul.f32 %v1884_v21, %v1879_v51 }
 0x494   : > { %v1892_v26 = vsel %vm784_vm2, %v1889_v19, %v1891_v36  ;;  %v1893_v37 = vsel %vm784_vm2, %v1891_v36, %v1889_v19 }
 0x495   : > { %v1894_v41 = vmul.f32 %v1893_v37, %v4118_v42  ;;  %v1895_v48 = vmul.f32 %v1892_v26, %v4121_v43 }
 0x497   : > { %v1929_v49 = vpop.permute.xlu0 %1928  ;;  %v1995_v18 = vpop.permute.xlu1 %1994  ;;  %v1903_v53 = vmul.f32 %v1901_v10, %v1894_v41  ;;  %v1904_v54 = vmul.f32 %v1901_v10, %v1895_v48 }
 0x498   : > { %v1930_v38 = vsel %vm846_vm3, %v1927_v33, %v1929_v49  ;;  %v1931_v52 = vsel %vm846_vm3, %v1929_v49, %v1927_v33 }
 0x499   : > { %v1932_v42 = vmul.f32 %v1931_v52, %v4146_v58  ;;  %v1933_v43 = vmul.f32 %v1930_v38, %v4149_v59  ;;  %v1905_v9 = vadd.f32 %v1903_v53, %v1886_v40  ;;  %v1906_v59 = vadd.f32 %v1904_v54, %v1887_v61 }
 0x49b   : > { %v1959_v24 = vpop.permute.xlu0 %1958  ;;  %v1910_v56 = vpop.permute.xlu1 %1909  ;;  %v1941_v31 = vmul.f32 %v1939_v11, %v1932_v42  ;;  %v1942_v33 = vmul.f32 %v1939_v11, %v1933_v43 }
 0x49c   : > { %v1911_v20 = vsel %vm815_vm4, %v1908_v27, %v1910_v56  ;;  %v1912_v39 = vsel %vm815_vm4, %v1910_v56, %v1908_v27  ;;  %v1960_v8 = vsel %vm888_vm5, %v1957_v23, %v1959_v24  ;;  %v1961_v58 = vsel %vm888_vm5, %v1959_v24, %v1957_v23 }
 0x49d   : > { %v1913_v4 = vmul.f32 %v1912_v39, %v4157_v62  ;;  %v1914_v5 = vmul.f32 %v1911_v20, %v4160_v63  ;;  %v1962_v27 = vmul.f32 %v1960_v8, %v4164_v0  ;;  %v1963_v21 = vmul.f32 %v1961_v58, %v4167_v3 }
 0x49e   : > { %v1953_v23 = vmul.f32 %v1950_v12, %v4418_v25 }
 0x49f   : > { %v1922_v10 = vmul.f32 %v1920_v22, %v1913_v4  ;;  %v1923_v28 = vmul.f32 %v1920_v22, %v1914_v5  ;;  %v2014_v19 = vpop.permute.xlu1 %2013  ;;  %v1997_v63 = vpop.permute.xlu0 %1996  ;;  %v1971_v41 = vmul.f32 %v1969_v15, %v1962_v27  ;;  %v1972_v0 = vmul.f32 %v1969_v15, %v1963_v21 }
 0x4a0   : > { %v1998_v49 = vsel %vm950_vm7, %v1995_v18, %v1997_v63  ;;  %v1999_v50 = vsel %vm950_vm7, %v1997_v63, %v1995_v18 }
 0x4a1   : > { %v1924_v62 = vadd.f32 %v1922_v10, %v1905_v9  ;;  %v1925_v36 = vadd.f32 %v1923_v28, %v1906_v59  ;;  %v2000_v15 = vmul.f32 %v1998_v49, %v4206_v57  ;;  %v2001_v53 = vmul.f32 %v1999_v50, %v4209_v60  ;;  %v2224_v49 = vld [vmem:[%s4784_s13] sm:$0xff]  ;;  %v2225_v50 = vld [vmem:[%s4784_s13 + $0x8] sm:$0xff] }
 0x4a3   : > { %v1943_v26 = vadd.f32 %v1941_v31, %v1924_v62  ;;  %v1944_v37 = vadd.f32 %v1942_v33, %v1925_v36  ;;  %v1978_v45 = vpop.permute.xlu1 %1977  ;;  %v2016_v12 = vpop.permute.xlu0 %2015  ;;  %v2010_v56 = vmul.f32 %v4459_v13, %v2001_v53  ;;  %v2050_v33 = vld [vmem:[%s4781_s10] sm:$0xff] }
 0x4a4   : > { %v1979_v22 = vsel %vm919_vm6, %v1976_v30, %v1978_v45  ;;  %v1980_v11 = vsel %vm919_vm6, %v1978_v45, %v1976_v30  ;;  %v2017_v54 = vsel %vm981_vm8, %v2014_v19, %v2016_v12  ;;  %v2018_v18 = vsel %vm981_vm8, %v2016_v12, %v2014_v19 }
 0x4a5   : > { %v1954_v48 = vadd.f32 %v1952_v44, %v1943_v26  ;;  %v1955_v3 = vadd.f32 %v1953_v23, %v1944_v37  ;;  %v1981_v14 = vmul.f32 %v1979_v22, %v4193_v46  ;;  %v1982_v25 = vmul.f32 %v1980_v11, %v4196_v47 }
 0x4a6   : > { %v2009_v47 = vmul.f32 %v4459_v13, %v2000_v15  ;;  %v2019_v42 = vmul.f32 %v2017_v54, %v4234_v17 }
 0x4a7   : > { %v1973_v51 = vadd.f32 %v1971_v41, %v1954_v48  ;;  %v1974_v38 = vadd.f32 %v1972_v0, %v1955_v3  ;;  %v1990_v52 = vmul.f32 %v4457_v29, %v1981_v14  ;;  %v1991_v30 = vmul.f32 %v4457_v29, %v1982_v25 }
 0x4a8   : > { %v2020_v29 = vmul.f32 %v2018_v18, %v4237_v55  ;;  %v2028_v60 = vmul.f32 %v4461_v16, %v2019_v42 }
 0x4a9   : > { %v1992_v46 = vadd.f32 %v1990_v52, %v1973_v51  ;;  %v1993_v24 = vadd.f32 %v1991_v30, %v1974_v38 }
 0x4aa   : > { %v2029_v20 = vmul.f32 %v4461_v16, %v2020_v29 }
 0x4ab   : > { %v2011_v43 = vadd.f32 %v2009_v47, %v1992_v46  ;;  %v2012_v57 = vadd.f32 %v2010_v56, %v1993_v24 }
 0x4ad   : > { %v2030_v39 = vadd.f32 %v2028_v60, %v2011_v43  ;;  %v2031_v40 = vadd.f32 %v2029_v20, %v2012_v57 }
 0x4b4   : > { %v2036_v61 = vpop.permute.xlu1 %2035  ;;  %v2134_v63 = vpop.permute.xlu0 %2133 }
 0x4b5   : > { %v2038_v4 = vadd.f32 %v2036_v61, %v2030_v39  ;;  %v2039_v5 = vadd.f32 %v2036_v61, %v2031_v40  ;;  %v3574_v39 = vld [vmem:[%s4784_s13 + $0x20] sm:$0xff] }
 0x4b7   : > { %v2042_v8 = vmul.f32 0.70710677, %v2038_v4  ;;  %v2043_v58 = vmul.f32 0.70710677, %v2039_v5  ;;  %v2040_v17 = vmul.f32 0.5, %v2038_v4  ;;  %v2041_v55 = vmul.f32 0.5, %v2039_v5 }
 0x4b8   : > { %v2139_v26 = vpop.permute.xlu1 %2138 }
 0x4b9   : > { %3839 = verf.f32 %v2042_v8 }
 0x4ba   : > { %3841 = verf.f32 %v2043_v58 }
 0x4c3   : > { %v3840_v13 = vpop.eup %3839 }
 0x4c4   : > { %v3842_v9 = vpop.eup %3841  ;;  %v2046_v59 = vadd.f32 1.0, %v3840_v13 }
 0x4c5   : > { %v2047_v10 = vadd.f32 1.0, %v3842_v9 }
 0x4c6   : > { %v2048_v28 = vmul.f32 %v2046_v59, %v2040_v17 }
 0x4c7   : > { %v2049_v19 = vmul.f32 %v2047_v10, %v2041_v55  ;;  %v3575_v55 = vld [vmem:[%s4784_s13 + $0x28] sm:$0xff] }
 0x4c8   : > { %v2051_v31 = vadd.f32 %v2048_v28, %v4018_v7  ;;  %v2127_v7 = vld [vmem:[%s4782_s11] sm:$0xff] }
 0x4c9   : > { %v2052_v16 = vadd.f32 %v2049_v19, %v4016_v6  ;;  %v2128_v6 = vld [vmem:[%s4782_s11 + $0x8] sm:$0xff] }
 0x4cb   : > { %2056 = vmatprep.subr.mxu0 %v2052_v16 }
 0x4cc   : > { %2057 = vmatpush1.msra.mxu0 %v2051_v31 }
 0x4cd   : > { %3565 = vmatmul.mubr.msk.f32.vlgmr.msra.gmra.mrb[4].mxu0 %vm675_vm0, %v2050_v33 }
 0x4ce   : > { %2395 = vmatprep.mubr.f32.mxu0 %v3859_v1 }
 0x5a0   : > { %v4526_v27 = vpop.f32.mrb[4].mxu0 }
 0x5a1   : > { %v4528_v21 = vpop.f32.mrb[5].mxu0 }
 0x5a2   : > { %2147 = vmatprep.subr.mxu1 %v4528_v21 }
 0x5a3   : > { %2148 = vmatpush1.msra.mxu1 %v4526_v27 }
 0x5a4   : > { %3566 = vmatmul.mubr.msk.f32.vlgmr.msra.gmra.mrb[2].mxu1 %vm675_vm0, %v2127_v7 }
 0x5a5   : > { %2217 = vmatprep.mubr.f32.mxu1 %v3859_v1 }
 0x5a8   : > { %3567 = vmatmul.mubr.msk.f32.gmra.mrb[4].mxu1 %vm675_vm0, %v2128_v6 }
 0x5a9   : > { %2312 = vmatprep.mubr.f32.mxu1 %v3859_v1 }
 0x677   : > { %v2213_v62 = vpop.f32.mrb[2].mxu1 }
 0x678   : > { %v2215_v36 = vpop.f32.mrb[3].mxu1  ;;  %v2214_v44 = vadd.f32 %v2213_v62, %v2134_v63 }
 0x679   : > { %v2216_v22 = vadd.f32 %v2215_v36, %v2134_v63 }
 0x67b   : > { %v2219_v37 = vpop.f32.mrb[4].mxu1 }
 0x67c   : > { %v2220_v23 = vadd.f32 %v2219_v37, %v2139_v26  ;;  %v2221_v45 = vpop.f32.mrb[5].mxu1 }
 0x67d   : > { %v2222_v11 = vadd.f32 %v2221_v45, %v2139_v26  ;;  %v3578_v26 = vld [vmem:[%s4784_s13 + $0x30] sm:$0xff] }
 0x67e   : > { %v3746_v41 = vpack.i.bf16 %v2220_v23, %v2214_v44  ;;  %v4542_v0 = vpack.c.bf16 %v2220_v23, %v2214_v44 }
 0x67f   : > { %v3751_v48 = vpack.i.bf16 %v2222_v11, %v2216_v22  ;;  %v4544_v3 = vpack.c.bf16 %v2222_v11, %v2216_v22 }
 0x680   : > { %3747 = vrot.lane.b32.xlu0 %v3746_v41, %s3869_s22 }
 0x681   : > { %3752 = vrot.lane.b32.xlu1 %v3751_v48, %s3869_s22  ;;  %3618 = vmatprep.subr.bf16.mxu0 %v4544_v3 }
 0x682   : > { %3620 = vmatpush1.bf16.msra.mxu0 %v4542_v0 }
 0x684   : > { %3757 = vrot.lane.b32.xlu0 %v3746_v41, %s4826_s1 }
 0x685   : > { %3762 = vrot.lane.b32.xlu1 %v3751_v48, %s4826_s1  ;;  %3572 = vmatmul.mubr.msk.f32.vlgmr.msra.gmra.mrb[6].mxu0 %vm2241_vm9, %v2224_v49  ;;  %s3871_s1 = smov 96  }
 0x686   : > { %2401 = vmatprep.mubr.f32.mxu0 %v3859_v1 }
 0x688   : > { %3767 = vrot.lane.b32.xlu0 %v3746_v41, %s4827_s30 }
 0x689   : > { %3772 = vrot.lane.b32.xlu1 %v3751_v48, %s4827_s30  ;;  %3573 = vmatmul.mubr.msk.f32.gmra.mrb[8].mxu0 %vm2241_vm9, %v2225_v50 }
 0x68a   : > { %2494 = vmatprep.mubr.f32.mxu0 %v3859_v1 }
 0x68c   : > { %3777 = vrot.lane.b32.xlu0 %v3746_v41, %s3870_s28 }
 0x68d   : > { %3782 = vrot.lane.b32.xlu1 %v3751_v48, %s3870_s28 }
 0x690   : > { %3787 = vrot.lane.b32.xlu0 %v3746_v41, %s3871_s1 }
 0x691   : > { %3792 = vrot.lane.b32.xlu1 %v3751_v48, %s3871_s1  ;;  %s656_s1 = scalar_lea.vmem %s4792_s21, %s4834_s3 }
 0x694   : > { %3797 = vrot.lane.b32.xlu0 %v3746_v41, %s3872_s24 }
 0x695   : > { %3812 = vrot.lane.b32.xlu1 %v3751_v48, %s3872_s24 }
 0x698   : > { %3802 = vrot.lane.b32.xlu0 %v3746_v41, %s4832_s23 }
 0x699   : > { %3817 = vrot.lane.b32.xlu1 %v3751_v48, %s4832_s23 }
 0x69c   : > { %3807 = vrot.lane.b32.xlu0 %v3746_v41, %s3873_s26 }
 0x69d   : > { %3822 = vrot.lane.b32.xlu1 %v3751_v48, %s3873_s26 }
 0x6f2   : > { %v3748_v14 = vpop.permute.xlu0 %3747 }
 0x6f3   : > { %v3750_v25 = vunpack.i.h.bf16 %v3748_v14  ;;  %v3749_v12 = vunpack.i.l.bf16 %v3748_v14  ;;  %v3753_v51 = vpop.permute.xlu1 %3752  ;;  %v3579_v14 = vld [vmem:[%s4784_s13 + $0x38] sm:$0xff] }
 0x6f4   : > { %v3755_v38 = vunpack.i.h.bf16 %v3753_v51  ;;  %v3754_v52 = vunpack.i.l.bf16 %v3753_v51 }
 0x6f6   : > { %v2420_v30 = vsel %vm2419_vm10, %v3749_v12, %v3754_v52  ;;  %v2421_v15 = vsel %vm2419_vm10, %v3750_v25, %v3755_v38  ;;  %v3758_v53 = vpop.permute.xlu0 %3757  ;;  %v2422_v54 = vsel %vm2419_vm10, %v3754_v52, %v3749_v12  ;;  %v2423_v18 = vsel %vm2419_vm10, %v3755_v38, %v3750_v25  ;;  %v3582_v52 = vld [vmem:[%s4784_s13 + $0x40] sm:$0xff] }
 0x6f7   : > { %v3623_v46 = vpack.c.bf16 %v2421_v15, %v2420_v30  ;;  %v3760_v24 = vunpack.i.h.bf16 %v3758_v53  ;;  %v3759_v47 = vunpack.i.l.bf16 %v3758_v53  ;;  %v3763_v56 = vpop.permute.xlu1 %3762  ;;  %v3621_v42 = vpack.c.bf16 %v2423_v18, %v2422_v54 }
 0x6f8   : > { %v3765_v29 = vunpack.i.h.bf16 %v3763_v56  ;;  %v3764_v43 = vunpack.i.l.bf16 %v3763_v56 }
 0x6f9   : > { %3622 = vmatprep.subr.bf16.mxu0 %v3621_v42 }
 0x6fa   : > { %v2522_v57 = vsel %vm950_vm7, %v3759_v47, %v3764_v43  ;;  %v2523_v60 = vsel %vm950_vm7, %v3760_v24, %v3765_v29  ;;  %v3768_v20 = vpop.permute.xlu0 %3767  ;;  %3624 = vmatpush1.bf16.msra.mxu0 %v3623_v46  ;;  %v2524_v40 = vsel %vm950_vm7, %v3764_v43, %v3759_v47  ;;  %v2525_v61 = vsel %vm950_vm7, %v3765_v29, %v3760_v24 }
 0x6fb   : > { %v3627_v4 = vpack.c.bf16 %v2523_v60, %v2522_v57  ;;  %v3770_v5 = vunpack.i.h.bf16 %v3768_v20  ;;  %v3769_v8 = vunpack.i.l.bf16 %v3768_v20  ;;  %v3773_v58 = vpop.permute.xlu1 %3772  ;;  %v3625_v13 = vpack.c.bf16 %v2525_v61, %v2524_v40  ;;  %v3583_v40 = vld [vmem:[%s4784_s13 + $0x48] sm:$0xff] }
 0x6fc   : > { %v3775_v9 = vunpack.i.h.bf16 %v3773_v58  ;;  %v3774_v17 = vunpack.i.l.bf16 %v3773_v58 }
 0x6fd   : > { %3576 = vmatmul.mubr.msk.f32.vlgmr.msra.gmra.mrb[6].mxu0 %vm2241_vm9, %v3574_v39  ;;  %3626 = vmatprep.subr.bf16.mxu0 %v3625_v13  ;;  %v3586_v13 = vld [vmem:[%s4784_s13 + $0x50] sm:$0xff] }
 0x6fe   : > { %v3778_v59 = vpop.permute.xlu0 %3777  ;;  %3628 = vmatpush1.bf16.msra.mxu0 %v3627_v4  ;;  %2500 = vmatprep.mubr.f32.mxu0 %v3859_v1  ;;  %v2626_v10 = vsel %vm981_vm8, %v3774_v17, %v3769_v8  ;;  %v2627_v16 = vsel %vm981_vm8, %v3775_v9, %v3770_v5  ;;  %v2624_v62 = vsel %vm981_vm8, %v3769_v8, %v3774_v17 }
 0x6ff   : > { %v3780_v28 = vunpack.i.h.bf16 %v3778_v59  ;;  %v3779_v19 = vunpack.i.l.bf16 %v3778_v59  ;;  %v3783_v31 = vpop.permute.xlu1 %3782  ;;  %v3629_v6 = vpack.c.bf16 %v2627_v16, %v2626_v10  ;;  %v2625_v36 = vsel %vm981_vm8, %v3770_v5, %v3775_v9 }
 0x700   : > { %v3785_v33 = vunpack.i.h.bf16 %v3783_v31  ;;  %v3784_v7 = vunpack.i.l.bf16 %v3783_v31  ;;  %v3631_v45 = vpack.c.bf16 %v2625_v36, %v2624_v62  ;;  %v3569_v62 = vld [vmem:[%s4784_s13 + $0x18] sm:$0xff] }
 0x701   : > { %3577 = vmatmul.mubr.msk.f32.gmra.mrb[8].mxu0 %vm2241_vm9, %v3575_v55  ;;  %3630 = vmatprep.subr.bf16.mxu0 %v3629_v6  ;;  %v3587_v6 = vld [vmem:[%s4784_s13 + $0x58] sm:$0xff] }
 0x702   : > { %v3788_v63 = vpop.permute.xlu0 %3787  ;;  %2596 = vmatprep.mubr.f32.mxu0 %v3859_v1  ;;  %v2729_v37 = vsel %vm2726_vm11, %v3784_v7, %v3779_v19  ;;  %v2730_v23 = vsel %vm2726_vm11, %v3785_v33, %v3780_v28  ;;  %v2727_v12 = vsel %vm2726_vm11, %v3779_v19, %v3784_v7  ;;  %v2728_v51 = vsel %vm2726_vm11, %v3780_v28, %v3785_v33  ;;  %v3568_v28 = vld [vmem:[%s4784_s13 + $0x10] sm:$0xff] }
 0x703   : > { %v3793_v44 = vpop.permute.xlu1 %3792  ;;  %v3633_v22 = vpack.c.bf16 %v2730_v23, %v2729_v37  ;;  %v3790_v11 = vunpack.i.h.bf16 %v3788_v63  ;;  %v3789_v41 = vunpack.i.l.bf16 %v3788_v63  ;;  %v3635_v46 = vpack.c.bf16 %v2728_v51, %v2727_v12 }
 0x704   : > { %v3795_v48 = vunpack.i.h.bf16 %v3793_v44  ;;  %v3794_v49 = vunpack.i.l.bf16 %v3793_v44 }
 0x705   : > { %3580 = vmatmul.mubr.msk.f32.vlgmr.msra.gmra.mrb[6].mxu0 %vm2241_vm9, %v3578_v26  ;;  %v3590_v26 = vld [vmem:[%s4784_s13 + $0x60] sm:$0xff] }
 0x706   : > { %3632 = vmatpush1.bf16.msra.mxu0 %v3631_v45  ;;  %v4600_v50 = vpop.permute.xlu0 %3797  ;;  %2602 = vmatprep.mubr.f32.mxu0 %v3859_v1  ;;  %v2832_v30 = vsel %vm2829_vm12, %v3794_v49, %v3789_v41  ;;  %v2833_v15 = vsel %vm2829_vm12, %v3795_v48, %v3790_v11  ;;  %v2830_v8 = vsel %vm2829_vm12, %v3789_v41, %v3794_v49 }
 0x707   : > { %3634 = vmatprep.subr.bf16.mxu0 %v3633_v22  ;;  %v3813_v25 = vpop.permute.xlu1 %3812  ;;  %v3800_v56 = vunpack.i.h.bf16 %v4600_v50  ;;  %v3799_v42 = vunpack.i.l.bf16 %v4600_v50  ;;  %v3637_v43 = vpack.c.bf16 %v2833_v15, %v2832_v30  ;;  %v2831_v58 = vsel %vm2829_vm12, %v3790_v11, %v3795_v48  ;;  %v3591_v22 = vld [vmem:[%s4784_s13 + $0x68] sm:$0xff]  ;;  %v3594_v48 = vld [vmem:[%s4784_s13 + $0x70] sm:$0xff]  ;;  %v3595_v50 = vld [vmem:[%s4784_s13 + $0x78] sm:$0xff] }
 0x708   : > { %v3815_v29 = vunpack.i.h.bf16 %v3813_v25  ;;  %v3814_v57 = vunpack.i.l.bf16 %v3813_v25  ;;  %v3639_v10 = vpack.c.bf16 %v2831_v58, %v2830_v8 }
 0x709   : > { %3581 = vmatmul.mubr.msk.f32.gmra.mrb[8].mxu0 %vm2241_vm9, %v3579_v14  ;;  %v3599_v14 = vld [vmem:[%s4784_s13 + $0x88] sm:$0xff] }
 0x70a   : > { %v3803_v38 = vpop.permute.xlu0 %3802  ;;  %2698 = vmatprep.mubr.f32.mxu0 %v3859_v1  ;;  %v2935_v9 = vsel %vm2932_vm13, %v3814_v57, %v3799_v42  ;;  %v2936_v17 = vsel %vm2932_vm13, %v3815_v29, %v3800_v56  ;;  %v2933_v36 = vsel %vm2932_vm13, %v3799_v42, %v3814_v57  ;;  %v2934_v63 = vsel %vm2932_vm13, %v3800_v56, %v3815_v29 }
 0x70b   : > { %v3805_v53 = vunpack.i.h.bf16 %v3803_v38  ;;  %v3804_v54 = vunpack.i.l.bf16 %v3803_v38  ;;  %v3818_v18 = vpop.permute.xlu1 %3817  ;;  %v3641_v19 = vpack.c.bf16 %v2936_v17, %v2935_v9  ;;  %v3643_v23 = vpack.c.bf16 %v2934_v63, %v2933_v36  ;;  %v3167_v17 = vld [vmem:[%s4787_s16 + $0x8] sm:$0xff] }
 0x70c   : > { %v3820_v24 = vunpack.i.h.bf16 %v3818_v18  ;;  %v3819_v47 = vunpack.i.l.bf16 %v3818_v18 }
 0x70d   : > { %3584 = vmatmul.mubr.msk.f32.vlgmr.msra.gmra.mrb[6].mxu0 %vm2241_vm9, %v3582_v52  ;;  %v3127_v52 = vld [vmem:[%s4833_s4] sm:$0x3] }
 0x70e   : > { %v2237_v60 = vsel %vm888_vm5, %v3804_v54, %v3819_v47  ;;  %v2238_v20 = vsel %vm888_vm5, %v3805_v53, %v3820_v24  ;;  %3636 = vmatpush1.bf16.msra.mxu0 %v3635_v46  ;;  %2704 = vmatprep.mubr.f32.mxu0 %v3859_v1  ;;  %v2239_v39 = vsel %vm888_vm5, %v3819_v47, %v3804_v54  ;;  %v3808_v59 = vpop.permute.xlu0 %3807  ;;  %vm3128_vm15 = vcmp.gt.f32.partialorder %v3127_v52, 0.5 }
 0x70f   : > { %v3615_v61 = vpack.c.bf16 %v2238_v20, %v2237_v60  ;;  %3638 = vmatprep.subr.bf16.mxu0 %v3637_v43  ;;  %v2240_v4 = vsel %vm888_vm5, %v3820_v24, %v3805_v53  ;;  %v3823_v55 = vpop.permute.xlu1 %3822  ;;  %v3810_v31 = vunpack.i.h.bf16 %v3808_v59  ;;  %v3809_v16 = vunpack.i.l.bf16 %v3808_v59  ;;  %v3264_v59 = vld [vmem:[%s4789_s18 + $0x8] sm:$0xff] }
 0x710   : > { %v3613_v5 = vpack.c.bf16 %v2240_v4, %v2239_v39  ;;  %v3825_v33 = vunpack.i.h.bf16 %v3823_v55  ;;  %v3824_v7 = vunpack.i.l.bf16 %v3823_v55  ;;  %v3129_v30 = vsel %vm3128_vm15, 1, %v3860_v2 }
 0x711   : > { %3585 = vmatmul.mubr.msk.f32.gmra.mrb[8].mxu0 %vm2241_vm9, %v3583_v40  ;;  %v3133_v15 = vrot.slane %v3129_v30, %v4099_v34  ;;  %v3137_v53 = vrot.slane %v3129_v30, %v4101_v35  ;;  %v3166_v34 = vld [vmem:[%s4787_s16] sm:$0xff] }
 0x712   : > { %3614 = vmatprep.subr.bf16.mxu1 %v3613_v5  ;;  %2801 = vmatprep.mubr.f32.mxu0 %v3859_v1  ;;  %v3038_v37 = vsel %vm3035_vm14, %v3824_v7, %v3809_v16  ;;  %v3039_v44 = vsel %vm3035_vm14, %v3825_v33, %v3810_v31  ;;  %v3036_v11 = vsel %vm3035_vm14, %v3809_v16, %v3824_v7  ;;  %v3263_v35 = vld [vmem:[%s4789_s18] sm:$0xff]  ;;  %v3151_v5 = vld [vmem:[%s4785_s14 + $0x8] sm:$0xff] }
 0x713   : > { %3616 = vmatpush1.bf16.msra.mxu1 %v3615_v61  ;;  %v3645_v45 = vpack.c.bf16 %v3039_v44, %v3038_v37  ;;  %v3037_v41 = vsel %vm3035_vm14, %v3810_v31, %v3825_v33  ;;  %vm3138_vm0 = vcmp.eq.s32.totalorder %v3133_v15, 1  ;;  %vm3139_vm1 = vcmp.eq.s32.totalorder %v3137_v53, 1  ;;  %v3363_v40 = vld [vmem:[%s4791_s20] sm:$0xff]  ;;  %v3155_v16 = vld [vmem:[%s4786_s15 + $0x8] sm:$0xff] }
 0x714   : > { %v3647_v49 = vpack.c.bf16 %v3037_v41, %v3036_v11  ;;  %v3150_v61 = vld [vmem:[%s4785_s14] sm:$0xff] }
 0x715   : > { %3588 = vmatmul.mubr.msk.f32.vlgmr.msra.gmra.mrb[6].mxu0 %vm2241_vm9, %v3586_v13  ;;  %v3154_v31 = vld [vmem:[%s4786_s15] sm:$0xff] }
 0x716   : > { %3640 = vmatpush1.bf16.msra.mxu0 %v3639_v10  ;;  %2807 = vmatprep.mubr.f32.mxu0 %v3859_v1  ;;  %v3261_v33 = vld [vmem:[%s4788_s17] sm:$0xff] }
 0x717   : > { %3642 = vmatprep.subr.bf16.mxu0 %v3641_v19  ;;  %3570 = vmatmul.mubr.msk.f32.vlgmr.msra.gmra.mrb[6].mxu1 %vm2241_vm9, %v3568_v28 }
 0x718   : > { %2318 = vmatprep.mubr.f32.mxu1 %v3859_v1 }
 0x719   : > { %3589 = vmatmul.mubr.msk.f32.gmra.mrb[8].mxu0 %vm2241_vm9, %v3587_v6 }
 0x71a   : > { %2904 = vmatprep.mubr.f32.mxu0 %v3859_v1 }
 0x71b   : > { %3571 = vmatmul.mubr.msk.f32.gmra.mrb[8].mxu1 %vm2241_vm9, %v3569_v62 }
 0x71c   : > { %3248 = vmatprep.mubr.f32.mxu1 %v3859_v1 }
 0x71d   : > { %3592 = vmatmul.mubr.msk.f32.vlgmr.msra.gmra.mrb[6].mxu0 %vm2241_vm9, %v3590_v26 }
 0x71e   : > { %3644 = vmatpush1.bf16.msra.mxu0 %v3643_v23  ;;  %2910 = vmatprep.mubr.f32.mxu0 %v3859_v1 }
 0x71f   : > { %3646 = vmatprep.subr.bf16.mxu0 %v3645_v45 }
 0x721   : > { %3593 = vmatmul.mubr.msk.f32.gmra.mrb[8].mxu0 %vm2241_vm9, %v3591_v22 }
 0x722   : > { %3007 = vmatprep.mubr.f32.mxu0 %v3859_v1 }
 0x725   : > { %3596 = vmatmul.mubr.msk.f32.vlgmr.msra.gmra.mrb[6].mxu0 %vm2241_vm9, %v3594_v48 }
 0x726   : > { %3648 = vmatpush1.bf16.msra.mxu0 %v3647_v49  ;;  %3013 = vmatprep.mubr.f32.mxu0 %v3859_v1 }
 0x729   : > { %3597 = vmatmul.mubr.msk.f32.gmra.mrb[8].mxu0 %vm2241_vm9, %v3595_v50 }
 0x72a   : > { %3110 = vmatprep.mubr.f32.mxu0 %v3859_v1 }
 0x72d   : > { %3600 = vmatmul.mubr.msk.f32.vlgmr.msra.gmra.mrb[6].mxu0 %vm2241_vm9, %v3598_v32 }
 0x72e   : > { %3116 = vmatprep.mubr.f32.mxu0 %v3859_v1 }
 0x731   : > { %3601 = vmatmul.mubr.msk.f32.gmra.mrb[8].mxu0 %vm2241_vm9, %v3599_v14 }
 0x7ea   : > { %v2314_v25 = vpop.f32.mrb[6].mxu1 }
 0x7eb   : > { %v2316_v12 = vpop.f32.mrb[7].mxu1 }
 0x7ee   : > { %v2320_v51 = vpop.f32.mrb[8].mxu1 }
 0x7ef   : > { %v2322_v38 = vpop.f32.mrb[9].mxu1 }
 0x800   : > { %v3112_v54 = vpop.f32.mrb[6].mxu0 }
 0x801   : > { %v3661_v18 = vadd.f32 %v3112_v54, %v2314_v25  ;;  %v3114_v46 = vpop.f32.mrb[7].mxu0 }
 0x802   : > { %v3662_v24 = vadd.f32 %v3114_v46, %v2316_v12 }
 0x803   : > { %v3140_v47 = vsel %vm3138_vm0, %v3661_v18, -inf }
 0x804   : > { %v3118_v56 = vpop.f32.mrb[8].mxu0  ;;  %v3141_v42 = vsel %vm3139_vm1, %v3662_v24, -inf }
 0x805   : > { %v3663_v29 = vadd.f32 %v3118_v56, %v2320_v51  ;;  %v3120_v43 = vpop.f32.mrb[9].mxu0  ;;  %v3144_v57 = vmax.f32 %v3140_v47, %v3141_v42 }
 0x806   : > { %v3664_v60 = vadd.f32 %v3120_v43, %v2322_v38 }
 0x807   : > { %3145 = vmax.xlane.f32.xlu0 %v3144_v57  ;;  %v3142_v20 = vsel %vm3138_vm0, %v3663_v29, -inf }
 0x808   : > { %v3143_v2 = vsel %vm3139_vm1, %v3664_v60, -inf }
 0x809   : > { %v3147_v39 = vmax.f32 %v3142_v20, %v3143_v2 }
 0x80b   : > { %3148 = vmax.xlane.f32.xlu1 %v3147_v39 }
 0x81c   : > { %3170 = vperm.xlu1 %3745, %v3166_v34  }
 0x820   : > { %3267 = vperm.xlu1 %3745, %v3263_v35  }
 0x824   : > { %3366 = vperm.xlu1 %3745, %v3363_v40  }
 0x894   : > { %v3146_v4 = vpop.xlane.xlu0 %3145 }
 0x895   : > { %v3152_v58 = vadd.f32 %v3150_v61, %v3146_v4 }
 0x898   : > { %v3149_v8 = vpop.xlane.xlu1 %3148 }
 0x899   : > { %v3153_v13 = vadd.f32 %v3151_v5, %v3149_v8 }
 0x89b   : > { %v3826_v9 = vpack.i.bf16 %v3153_v13, %v3152_v58 }
 0x89d   : > { %3827 = vperm.xlu0 %3744, %v3826_v9  }
 0x8a1   : > { %3175 = vperm.xlu0 %3744, %v3167_v17  }
 0x8a5   : > { %3272 = vperm.xlu0 %3744, %v3264_v59  }
 0x91c   : > { %v3828_v55 = vpop.permute.xlu0 %3827 }
 0x91d   : > { %v3830_v10 = vunpack.i.h.bf16 %v3828_v55  ;;  %v3829_v28 = vunpack.i.l.bf16 %v3828_v55 }
 0x91f   : > { %v3649_v19 = vpack.c.bf16 %v3830_v10, %v3829_v28 }
 0x920   : > { %v3176_v7 = vpop.permute.xlu0 %3175 }
 0x921   : > { %3650 = vmatprep.subr.bf16.mxu1 %v3649_v19 }
 0x922   : > { %3652 = vmatpush1.bf16.msra.mxu1 %v3649_v19 }
 0x923   : > { %3654 = vmatprep.subr.bf16.mxu1 %v4544_v3  ;;  %v3171_v3 = vpop.permute.xlu1 %3170 }
 0x924   : > { %v3273_v62 = vpop.permute.xlu0 %3272 }
 0x925   : > { %3602 = vmatmul.mubr.msk.f32.vlgmr.msra.gmra.mrb[10].mxu1 %vm2241_vm9, %v3154_v31  ;;  %v3669_v37 = vadd.f32 %v3273_v62, %v3176_v7 }
 0x926   : > { %3656 = vmatpush1.bf16.msra.mxu1 %v4542_v0  ;;  %3254 = vmatprep.mubr.f32.mxu1 %v3859_v1  ;;  %v3262_v0 = vld [vmem:[%s4788_s17 + $0x8] sm:$0xff] }
 0x927   : > { %v3268_v6 = vpop.permute.xlu1 %3267 }
 0x928   : > { %v3665_v26 = vadd.f32 %v3268_v6, %v3171_v3 }
 0x929   : > { %3603 = vmatmul.mubr.msk.f32.gmra.mrb[12].mxu1 %vm2241_vm9, %v3155_v16 }
 0x92a   : > { %3345 = vmatprep.mubr.f32.mxu1 %v3859_v1 }
 0x92b   : > { %v3367_v50 = vpop.permute.xlu1 %3366 }
 0x92d   : > { %3604 = vmatmul.mubr.msk.f32.vlgmr.msra.gmra.mrb[10].mxu1 %vm2241_vm9, %v3261_v33 }
 0x92e   : > { %3351 = vmatprep.mubr.f32.mxu1 %v3859_v1 }
 0x931   : > { %3605 = vmatmul.mubr.msk.f32.gmra.mrb[12].mxu1 %vm2241_vm9, %v3262_v0 }
 0x932   : > { %3436 = vmatprep.mubr.f32.mxu1 %v3859_v1  ;;  %v3358_v1 = vld [vmem:[%s4790_s19] sm:$0xff] }
 0xa00   : > { %v3347_v36 = vpop.f32.mrb[10].mxu1 }
 0xa01   : > { %v3349_v63 = vpop.f32.mrb[11].mxu1  ;;  %v3666_v23 = vadd.f32 %v3665_v26, %v3347_v36 }
 0xa02   : > { %v3668_v11 = vadd.f32 %v3665_v26, %v3349_v63 }
 0xa04   : > { %v3353_v44 = vpop.f32.mrb[12].mxu1 }
 0xa05   : > { %v3670_v45 = vadd.f32 %v3669_v37, %v3353_v44  ;;  %v3355_v22 = vpop.f32.mrb[13].mxu1 }
 0xa06   : > { %v3672_v41 = vadd.f32 %v3669_v37, %v3355_v22 }
 0xa07   : > { %v3659_v48 = vpack.c.bf16 %v3670_v45, %v3666_v23 }
 0xa08   : > { %v3657_v49 = vpack.c.bf16 %v3672_v41, %v3668_v11 }
 0xa0a   : > { %3658 = vmatprep.subr.bf16.mxu1 %v3657_v49 }
 0xa0b   : > { %3660 = vmatpush1.bf16.msra.mxu1 %v3659_v48 }
 0xa0e   : > { %3606 = vmatmul.mubr.msk.f32.vlgmr.msra.gmra.mrb[14].mxu1 %vm2241_vm9, %v3358_v1 }
 0xae1   : > { %v3438_v32 = vpop.f32.mrb[14].mxu1 }
 0xae2   : > { %v3439_v14 = vadd.f32 %v3438_v32, %v3367_v50  ;;  %v3440_v25 = vpop.f32.mrb[15].mxu1 }
 0xae3   : > { %v3441_v12 = vadd.f32 %v3440_v25, %v3367_v50 }
 0xae4   : > { %v3607_v51 = vmul.f32 -1.442695, %v3439_v14 }
 0xae5   : > { %v3608_v38 = vmul.f32 -1.442695, %v3441_v12 }
 0xae6   : > { %3843 = vpow2.f32 %v3607_v51 }
 0xae7   : > { %3845 = vpow2.f32 %v3608_v38 }
 0xaf0   : > { %v3844_v52 = vpop.eup %3843 }
 0xaf1   : > { %v3846_v30 = vpop.eup %3845  ;;  %v3449_v15 = vadd.f32 1.0, %v3844_v52 }
 0xaf2   : > { %v3450_v53 = vadd.f32 1.0, %v3846_v30 }
 0xaf3   : > { %3847 = vrcp.f32 %v3449_v15 }
 0xaf4   : > { %3849 = vrcp.f32 %v3450_v53 }
 0xafd   : > { %v3848_v54 = vpop.eup %3847 }
 0xafe   : > { %v3850_v18 = vpop.eup %3849  ;;  %v3455_v46 = vmul.f32 %v3848_v54, %v4526_v27 }
 0xaff   : > { %v3456_v24 = vmul.f32 %v3850_v18, %v4528_v21 }
 0xb00   : > { %3457 = vst [vmem:[%s656_s1] sm:$0xff] %v3455_v46 }
 0xb01   : > { %3458 = vst [vmem:[%s656_s1 + $0x8] sm:$0xff] %v3456_v24 }
 0xb02 PF: > { %s31_s2 = sadd.s32 1, %s3857_s2  }
 0xb03   : > { %p28_p4 = scmp.ge.s32.totalorder %s31_s2, 4  }
 0xb05   :  { %30 = sbr.rel (!%p28_p4) target bundleno = 7 (0x7), region = 173 }

</bundles_post_ra>
